<compile_context>
chip_gen: v6e
topology: v6e:2x2x1
jax: 0.10.0
libtpu: 0.0.40
codegen_flags: <defaults>
</compile_context>

<pallas_src>
import math

import numpy as np
import jax
import jax.numpy as jnp
from jax.experimental import pallas as pl
from jax.experimental.pallas import tpu as pltpu


# ----------------------------------------------------------------------------
# helpers
# ----------------------------------------------------------------------------
def _round_up(x, m):
    return ((x + m - 1) // m) * m


_HALO = 128  # lane-aligned halo width; must be >= ceil(K / orig) (it is: K/orig <= 15)


# ----------------------------------------------------------------------------
# Pallas kernel: polyphase sinc resampler (+ optional fused codec quantize/mask)
# ----------------------------------------------------------------------------
def _make_resample_kernel(orig, new, K, Q, tile_p, apply_codec):
    """out[p, t] = sum_k filt[p, k] * x_pad[(f0 + t)*orig + k],  k = q*orig + r.

    Built from the de-interleaved window X[r, f] = x_pad[f*orig + r] as Q
    lane-shifted fused multiply-adds (VPU; the workload is HBM-bound and
    new<=4 / K<=28 makes the MXU irrelevant here).
    Optional epilogue: int16 quantize round trip + per-packet loss mask.
    """

    def kernel(*refs):
        if apply_codec:
            filt_ref, xa_ref, xb_ref, mask_ref, out_ref = refs
        else:
            filt_ref, xa_ref, xb_ref, out_ref = refs

        filt = filt_ref[...]                                            # (new, Q*orig)
        # main tile + 128-frame halo -> (orig, tile_p + HALO) window in VMEM
        xcat = jnp.concatenate([xa_ref[...], xb_ref[...]], axis=1)
        acc = jnp.zeros((new, tile_p), jnp.float32)
        for q in range(Q):                       # static loop, Q <= 15
            xq = xcat[:, q:q + tile_p]           # (orig, tile_p) lane-shifted view
            for r in range(orig):
                k = q * orig + r
                if k >= K:
                    break
                acc = acc + filt[:, k:k + 1] * xq[r:r + 1, :]

        if apply_codec:
            # int(s*32768) (truncation toward zero, == fptosi) -> int16 wrap
            # -> /32768, then zero the "lost" packets.  Wraparound (not
            # clamping) matches the reference's numpy .astype(np.int16).
            qi = (acc * 32768.0).astype(jnp.int32)
            qi = jnp.bitwise_and(qi + 32768, 0xFFFF) - 32768
            acc = qi.astype(jnp.float32) * (1.0 / 32768.0) * mask_ref[...]

        out_ref[...] = acc

    return kernel


# ----------------------------------------------------------------------------
# torchaudio.functional.resample filter (sinc_interp_hann), exact formula
# ----------------------------------------------------------------------------
def _sinc_resample_filter(orig_freq, new_freq, lowpass_filter_width=6, rolloff=0.99):
    base_freq = min(orig_freq, new_freq) * rolloff
    width = int(math.ceil(lowpass_filter_width * orig_freq / base_freq))
    idx = np.arange(-width, width + orig_freq, dtype=np.float64)[None, :] / orig_freq
    t = np.arange(0, -new_freq, -1, dtype=np.float64)[:, None] / new_freq + idx
    t = t * base_freq
    t = np.clip(t, -lowpass_filter_width, lowpass_filter_width)
    window = np.cos(t * math.pi / lowpass_filter_width / 2.0) ** 2
    t = t * math.pi
    scale = base_freq / orig_freq
    safe_t = np.where(t == 0.0, 1.0, t)
    kernels = np.where(t == 0.0, 1.0, np.sin(safe_t) / safe_t)
    kernels = kernels * window * scale
    return kernels.astype(np.float32), width      # [new, 2*width + orig]


def resample(x, orig_sr, new_sr, *, codec_frame=None, received=None):
    """x: [1, T] float32 -> [1, ceil(T*new/orig)] float32 (Pallas kernel).

    If codec_frame is given, the int16 quantize round trip and the per-packet
    loss mask (from `received`) are fused into the kernel epilogue so the
    codec-rate signal makes a single HBM round trip.
    """
    g = math.gcd(int(orig_sr), int(new_sr))
    orig, new = int(orig_sr) // g, int(new_sr) // g
    L = int(x.shape[-1])

    if orig == new and codec_frame is None:
        return x
    if orig == new:
        filt_np, width = np.ones((1, 1), np.float32), 0   # identity "resample"
    else:
        filt_np, width = _sinc_resample_filter(orig, new)
    K = filt_np.shape[1]
    Q = -(-K // orig)                     # taps per residue (ceil)
    Kq = Q * orig
    assert Q <= _HALO
    target_length = -(-new * L // orig)   # ceil(new*L/orig), torchaudio semantics

    # --- tiling over output frames (time on lanes; >=2 grid steps for megacore)
    P = L // orig + 1                     # frames the strided conv produces
    P128 = _round_up(P, 128)
    tile_p = min(8192, P128)
    if tile_p > 128:
        tile_p = min(tile_p, max(128, _round_up(-(-P // 2), 128)))
    P_pad = _round_up(P, tile_p)
    n_tiles = P_pad // tile_p
    W_total = P_pad + _HALO               # frame columns incl. zero halo tail

    # --- on-device prep: pad + de-interleave once.  No K-fold im2col inflation.
    right_pad = W_total * orig - width - L
    assert right_pad >= 0
    x_padded = jnp.pad(x[0], (width, right_pad))           # (W_total*orig,)
    X = x_padded.reshape(W_total, orig).T                  # (orig, W_total)

    filt_p = np.zeros((new, Kq), np.float32)
    filt_p[:, :K] = filt_np
    filt_j = jnp.asarray(filt_p)

    in_specs = [
        pl.BlockSpec((new, Kq), lambda i: (0, 0)),                     # filter, resident
        pl.BlockSpec((orig, tile_p), lambda i: (0, i)),                # main window
        pl.BlockSpec((orig, _HALO),                                    # 128-frame halo
                     lambda i: (0, (i + 1) * (tile_p // _HALO))),
    ]
    args = [filt_j, X, X]

    apply_codec = codec_frame is not None
    if apply_codec:
        F = int(codec_frame)
        num_packets = max(1, -(-target_length // F))
        recv = jnp.asarray(np.asarray(received, np.float32)[:num_packets])
        mask = jnp.repeat(recv, F)[:target_length]                     # per-sample mask
        mask = jnp.pad(mask, (0, P_pad * new - target_length))         # zeros beyond L_rs
        mask2d = (mask.reshape(1, P_pad) if new == 1
                  else mask.reshape(P_pad, new).T)                     # mask2d[p, t]
        in_specs.append(pl.BlockSpec((new, tile_p), lambda i: (0, i)))
        args.append(mask2d)

    cost = pl.CostEstimate(
        flops=2 * new * K * P_pad,
        transcendentals=0,
        bytes_accessed=4 * (orig * W_total
                            + (2 if apply_codec else 1) * new * P_pad
                            + new * P_pad))

    out = pl.pallas_call(
        _make_resample_kernel(orig, new, K, Q, tile_p, apply_codec),
        out_shape=jax.ShapeDtypeStruct((new, P_pad), jnp.float32),
        grid=(n_tiles,),
        in_specs=in_specs,
        out_specs=pl.BlockSpec((new, tile_p), lambda i: (0, i)),
        compiler_params=pltpu.CompilerParams(dimension_semantics=("parallel",)),
        cost_estimate=cost,
    )(*args)

    if new == 1:                          # 16k->8k and identity paths: no transpose
        return out[:, :target_length]
    nf = -(-target_length // new)
    y = out[:, :nf].T.reshape(1, -1)      # interleave phases (small XLA pass)
    return y[:, :target_length]


# ----------------------------------------------------------------------------
# Gilbert–Elliot packet-loss simulation (host-side, vectorized run lengths)
# ----------------------------------------------------------------------------
def gilbert_elliot_simulate(num_packets, plr, rng):
    # TODO(synk): exact GilbertElliotModel parameterization unavailable; use a
    # standard 2-state Markov chain whose stationary loss rate equals plr.
    if num_packets <= 0:
        return np.ones(0, dtype=np.int32)
    if plr <= 0.0:
        return np.ones(num_packets, dtype=np.int32)
    r = 0.25                                          # bad -> good
    p = min(1.0, plr * r / max(1e-8, 1.0 - plr))      # good -> bad
    pieces, total = [], 0
    while total < num_packets:
        n_pairs = max(16, int(num_packets * p) + 16)
        good = rng.geometric(p, size=n_pairs)         # consecutive received packets
        bad = rng.geometric(r, size=n_pairs)          # consecutive lost packets
        runs = np.stack([good, bad], axis=1).reshape(-1)
        vals = np.tile(np.array([1, 0], np.int32), n_pairs)
        seq = np.repeat(vals, runs)
        pieces.append(seq)
        total += seq.shape[0]
    return np.concatenate(pieces)[:num_packets].astype(np.int32)


# ----------------------------------------------------------------------------
# OpusAugment forward pass
# ----------------------------------------------------------------------------
class OpusAugmentPallas:
    def __init__(self, sample_rate, frame_duration, min_bps, max_bps,
                 min_packet_loss_rate, max_packet_loss_rate,
                 decode_missing_packet_rate, **kwargs):
        self.min_bps = min_bps
        self.max_bps = max_bps
        self.samples_per_second = sample_rate
        self.min_packet_loss_rate = min_packet_loss_rate
        self.max_packet_loss_rate = max_packet_loss_rate
        # TODO(synk): decode_missing_packet_rate (opus PLC) has no Pallas
        # equivalent; lost packets always decode to zeros.
        self.decode_missing_packet_rate = decode_missing_packet_rate
        self.channels = 1
        self.bytes_per_sample = 2
        self.desired_frame_duration = frame_duration / 1000.0

    def forward(self, x, bps=0, packet_loss_rate=-1, received=None, seed=0):
        rng = np.random.RandomState(seed)
        if bps == 0:
            bps = int(rng.randint(self.min_bps, self.max_bps))
        if bps < 12000:
            target_sps = 8000
        elif bps < 15000:
            target_sps = 12000
        else:
            target_sps = 16000
        desired_frame_size = int(self.desired_frame_duration * target_sps)
        original_length = int(x.shape[-1])

        if packet_loss_rate < 0.0:
            packet_loss_rate = (rng.rand()
                                * (self.max_packet_loss_rate
                                   - self.min_packet_loss_rate)
                                + self.min_packet_loss_rate)

        # codec-rate length after resampling: ceil(L * new / orig)
        g = math.gcd(self.samples_per_second, target_sps)
        L_rs = -(-(target_sps // g) * original_length // (self.samples_per_second // g))
        num_packets = max(1, -(-L_rs // desired_frame_size))
        if received is None:
            received = gilbert_elliot_simulate(num_packets, packet_loss_rate, rng)
        received = np.asarray(received, dtype=np.int32)[:num_packets]

        # resample to the codec rate + int16 quantize + packet-loss mask,
        # all fused into one Pallas kernel (single HBM round trip).
        y_codec = resample(x, self.samples_per_second, target_sps,
                           codec_frame=desired_frame_size, received=received)

        # the reference decodes whole packets (zero tail of the last packet),
        # then slices to original_length
        dec_len = num_packets * desired_frame_size
        if dec_len > L_rs:
            y_codec = jnp.pad(y_codec, ((0, 0), (0, dec_len - L_rs)))
        decoded = y_codec[:, :original_length]

        # resample back to the original rate (second Pallas kernel)
        decoded_pcm = resample(decoded, target_sps, self.samples_per_second)

        # pad / truncate to original length
        if decoded_pcm.shape[-1] < original_length:
            zeros = jnp.zeros((1, original_length - decoded_pcm.shape[-1]),
                              jnp.float32)
            decoded_pcm = jnp.concatenate([decoded_pcm, zeros], axis=-1)
        elif decoded_pcm.shape[-1] > original_length:
            decoded_pcm = decoded_pcm[:, :original_length]

        return (decoded_pcm, bps, packet_loss_rate, target_sps, received)


# ----------------------------------------------------------------------------
# pure-numpy reference of the same approximation (for a correctness check)
# ----------------------------------------------------------------------------
def _np_resample(sig, o_sr, n_sr):
    g = math.gcd(int(o_sr), int(n_sr))
    o, n = int(o_sr) // g, int(n_sr) // g
    if o == n:
        return sig.astype(np.float64)
    filt, width = _sinc_resample_filter(o, n)
    filt = filt.astype(np.float64)
    L = sig.shape[-1]
    xp = np.pad(sig[0].astype(np.float64), (width, width + o))
    K = filt.shape[1]
    P = (xp.shape[0] - K) // o + 1
    frames = np.stack([xp[f * o: f * o + K] for f in range(P)], axis=1)   # (K, P)
    out = filt @ frames
    return out.T.reshape(1, -1)[:, : -(-n * L // o)]


def _np_forward(x_np, sr, tsr, F, received, original_length):
    y = _np_resample(x_np, sr, tsr)
    q = np.trunc(y * 32768.0).astype(np.int64).astype(np.int16).astype(np.float64) / 32768.0
    L_rs = y.shape[-1]
    n_pk = received.shape[0]
    full = np.zeros((1, n_pk * F))
    full[:, :L_rs] = q
    mask = np.repeat(received.astype(np.float64), F)[None, :]
    dec = (full * mask)[:, :original_length]
    out = _np_resample(dec, tsr, sr)
    if out.shape[-1] < original_length:
        out = np.pad(out, ((0, 0), (0, original_length - out.shape[-1])))
    else:
        out = out[:, :original_length]
    return out


# ----------------------------------------------------------------------------
# main
# ----------------------------------------------------------------------------
if __name__ == "__main__":
    key = jax.random.PRNGKey(0)
    T = 1600  # 0.1 s at 16 kHz
    x = 0.5 * jax.random.normal(key, (1, T), dtype=jnp.float32)
    x = jnp.clip(x, -0.999, 0.999)

    aug = OpusAugmentPallas(
        sample_rate=16000,
        frame_duration=20,          # ms
        min_bps=6000,
        max_bps=24000,
        min_packet_loss_rate=0.0,
        max_packet_loss_rate=0.3,
        decode_missing_packet_rate=0.5,
    )

    y, bps, plr, target_sr, received = aug.forward(
        x, bps=10000, packet_loss_rate=0.2)
    y = jax.block_until_ready(y)

    assert y.shape == (1, T), y.shape
    assert y.dtype == jnp.float32
    assert target_sr == 8000
    assert received.shape[0] == 5          # ceil(800 samples / 160-sample frames)
    assert bool(jnp.all(jnp.isfinite(y)))

    # numeric check against the pure-numpy reference of the same approximation
    y_ref = _np_forward(np.asarray(x), 16000, target_sr, 160, received, T)
    err = float(np.max(np.abs(np.asarray(y) - y_ref)))
    assert err < 1e-3, f"max abs error {err}"

    print("KERNEL_OK")
</pallas_src>

<mosaic_0001>
module attributes {stable_mosaic.version = 11 : i64} {
  func.func @kernel(%arg0: i32, %arg1: memref<1x28xf32, #tpu.memory_space<vmem>>, %arg2: memref<2x512xf32, #tpu.memory_space<vmem>>, %arg3: memref<2x128xf32, #tpu.memory_space<vmem>>, %arg4: memref<1x512xf32, #tpu.memory_space<vmem>>, %arg5: memref<1x512xf32, #tpu.memory_space<vmem>>) attributes {dimension_semantics = [#tpu.dimension_semantics<parallel>], iteration_bounds = array<i64: 2>, scalar_prefetch = 0 : i64, scratch_operands = 0 : i64, tpu.core_type = #tpu.core_type<tc>, window_params = [{pipeline_mode = #tpu.pipeline_mode<synchronous>, transform_indices = @transform_0, window_bounds = array<i64: 1, 28>}, {transform_indices = @transform_1, window_bounds = array<i64: 2, 512>}, {transform_indices = @transform_2, window_bounds = array<i64: 2, 128>}, {transform_indices = @transform_3, window_bounds = array<i64: 1, 512>}, {transform_indices = @transform_4, window_bounds = array<i64: 1, 512>}]} {
    %c0 = arith.constant 0 : index
    %c0_0 = arith.constant 0 : index
    %0 = vector.load %arg1[%c0, %c0_0] : memref<1x28xf32, #tpu.memory_space<vmem>>, vector<1x28xf32>
    %c0_1 = arith.constant 0 : index
    %c0_2 = arith.constant 0 : index
    %1 = vector.load %arg2[%c0_1, %c0_2] : memref<2x512xf32, #tpu.memory_space<vmem>>, vector<2x512xf32>
    %c0_3 = arith.constant 0 : index
    %c0_4 = arith.constant 0 : index
    %2 = vector.load %arg3[%c0_3, %c0_4] : memref<2x128xf32, #tpu.memory_space<vmem>>, vector<2x128xf32>
    %3 = tpu.concatenate %1, %2 in 1 : vector<2x512xf32>, vector<2x128xf32> -> vector<2x640xf32>
    %cst = arith.constant 0.000000e+00 : f32
    %4 = vector.broadcast %cst : f32 to vector<1x512xf32>
    %5 = vector.extract_strided_slice %3 {offsets = [0, 0], sizes = [2, 512], strides = [1, 1]} : vector<2x640xf32> to vector<2x512xf32>
    %6 = vector.extract_strided_slice %0 {offsets = [0, 0], sizes = [1, 1], strides = [1, 1]} : vector<1x28xf32> to vector<1x1xf32>
    %7 = vector.extract_strided_slice %5 {offsets = [0, 0], sizes = [1, 512], strides = [1, 1]} : vector<2x512xf32> to vector<1x512xf32>
    %8 = vector.broadcast %6 : vector<1x1xf32> to vector<1x512xf32>
    %9 = arith.mulf %8, %7 : vector<1x512xf32>
    %10 = arith.addf %4, %9 : vector<1x512xf32>
    %11 = vector.extract_strided_slice %0 {offsets = [0, 1], sizes = [1, 1], strides = [1, 1]} : vector<1x28xf32> to vector<1x1xf32>
    %12 = vector.extract_strided_slice %5 {offsets = [1, 0], sizes = [1, 512], strides = [1, 1]} : vector<2x512xf32> to vector<1x512xf32>
    %13 = vector.broadcast %11 : vector<1x1xf32> to vector<1x512xf32>
    %14 = arith.mulf %13, %12 : vector<1x512xf32>
    %15 = arith.addf %10, %14 : vector<1x512xf32>
    %16 = vector.extract_strided_slice %3 {offsets = [0, 1], sizes = [2, 512], strides = [1, 1]} : vector<2x640xf32> to vector<2x512xf32>
    %17 = vector.extract_strided_slice %0 {offsets = [0, 2], sizes = [1, 1], strides = [1, 1]} : vector<1x28xf32> to vector<1x1xf32>
    %18 = vector.extract_strided_slice %16 {offsets = [0, 0], sizes = [1, 512], strides = [1, 1]} : vector<2x512xf32> to vector<1x512xf32>
    %19 = vector.broadcast %17 : vector<1x1xf32> to vector<1x512xf32>
    %20 = arith.mulf %19, %18 : vector<1x512xf32>
    %21 = arith.addf %15, %20 : vector<1x512xf32>
    %22 = vector.extract_strided_slice %0 {offsets = [0, 3], sizes = [1, 1], strides = [1, 1]} : vector<1x28xf32> to vector<1x1xf32>
    %23 = vector.extract_strided_slice %16 {offsets = [1, 0], sizes = [1, 512], strides = [1, 1]} : vector<2x512xf32> to vector<1x512xf32>
    %24 = vector.broadcast %22 : vector<1x1xf32> to vector<1x512xf32>
    %25 = arith.mulf %24, %23 : vector<1x512xf32>
    %26 = arith.addf %21, %25 : vector<1x512xf32>
    %27 = vector.extract_strided_slice %3 {offsets = [0, 2], sizes = [2, 512], strides = [1, 1]} : vector<2x640xf32> to vector<2x512xf32>
    %28 = vector.extract_strided_slice %0 {offsets = [0, 4], sizes = [1, 1], strides = [1, 1]} : vector<1x28xf32> to vector<1x1xf32>
    %29 = vector.extract_strided_slice %27 {offsets = [0, 0], sizes = [1, 512], strides = [1, 1]} : vector<2x512xf32> to vector<1x512xf32>
    %30 = vector.broadcast %28 : vector<1x1xf32> to vector<1x512xf32>
    %31 = arith.mulf %30, %29 : vector<1x512xf32>
    %32 = arith.addf %26, %31 : vector<1x512xf32>
    %33 = vector.extract_strided_slice %0 {offsets = [0, 5], sizes = [1, 1], strides = [1, 1]} : vector<1x28xf32> to vector<1x1xf32>
    %34 = vector.extract_strided_slice %27 {offsets = [1, 0], sizes = [1, 512], strides = [1, 1]} : vector<2x512xf32> to vector<1x512xf32>
    %35 = vector.broadcast %33 : vector<1x1xf32> to vector<1x512xf32>
    %36 = arith.mulf %35, %34 : vector<1x512xf32>
    %37 = arith.addf %32, %36 : vector<1x512xf32>
    %38 = vector.extract_strided_slice %3 {offsets = [0, 3], sizes = [2, 512], strides = [1, 1]} : vector<2x640xf32> to vector<2x512xf32>
    %39 = vector.extract_strided_slice %0 {offsets = [0, 6], sizes = [1, 1], strides = [1, 1]} : vector<1x28xf32> to vector<1x1xf32>
    %40 = vector.extract_strided_slice %38 {offsets = [0, 0], sizes = [1, 512], strides = [1, 1]} : vector<2x512xf32> to vector<1x512xf32>
    %41 = vector.broadcast %39 : vector<1x1xf32> to vector<1x512xf32>
    %42 = arith.mulf %41, %40 : vector<1x512xf32>
    %43 = arith.addf %37, %42 : vector<1x512xf32>
    %44 = vector.extract_strided_slice %0 {offsets = [0, 7], sizes = [1, 1], strides = [1, 1]} : vector<1x28xf32> to vector<1x1xf32>
    %45 = vector.extract_strided_slice %38 {offsets = [1, 0], sizes = [1, 512], strides = [1, 1]} : vector<2x512xf32> to vector<1x512xf32>
    %46 = vector.broadcast %44 : vector<1x1xf32> to vector<1x512xf32>
    %47 = arith.mulf %46, %45 : vector<1x512xf32>
    %48 = arith.addf %43, %47 : vector<1x512xf32>
    %49 = vector.extract_strided_slice %3 {offsets = [0, 4], sizes = [2, 512], strides = [1, 1]} : vector<2x640xf32> to vector<2x512xf32>
    %50 = vector.extract_strided_slice %0 {offsets = [0, 8], sizes = [1, 1], strides = [1, 1]} : vector<1x28xf32> to vector<1x1xf32>
    %51 = vector.extract_strided_slice %49 {offsets = [0, 0], sizes = [1, 512], strides = [1, 1]} : vector<2x512xf32> to vector<1x512xf32>
    %52 = vector.broadcast %50 : vector<1x1xf32> to vector<1x512xf32>
    %53 = arith.mulf %52, %51 : vector<1x512xf32>
    %54 = arith.addf %48, %53 : vector<1x512xf32>
    %55 = vector.extract_strided_slice %0 {offsets = [0, 9], sizes = [1, 1], strides = [1, 1]} : vector<1x28xf32> to vector<1x1xf32>
    %56 = vector.extract_strided_slice %49 {offsets = [1, 0], sizes = [1, 512], strides = [1, 1]} : vector<2x512xf32> to vector<1x512xf32>
    %57 = vector.broadcast %55 : vector<1x1xf32> to vector<1x512xf32>
    %58 = arith.mulf %57, %56 : vector<1x512xf32>
    %59 = arith.addf %54, %58 : vector<1x512xf32>
    %60 = vector.extract_strided_slice %3 {offsets = [0, 5], sizes = [2, 512], strides = [1, 1]} : vector<2x640xf32> to vector<2x512xf32>
    %61 = vector.extract_strided_slice %0 {offsets = [0, 10], sizes = [1, 1], strides = [1, 1]} : vector<1x28xf32> to vector<1x1xf32>
    %62 = vector.extract_strided_slice %60 {offsets = [0, 0], sizes = [1, 512], strides = [1, 1]} : vector<2x512xf32> to vector<1x512xf32>
    %63 = vector.broadcast %61 : vector<1x1xf32> to vector<1x512xf32>
    %64 = arith.mulf %63, %62 : vector<1x512xf32>
    %65 = arith.addf %59, %64 : vector<1x512xf32>
    %66 = vector.extract_strided_slice %0 {offsets = [0, 11], sizes = [1, 1], strides = [1, 1]} : vector<1x28xf32> to vector<1x1xf32>
    %67 = vector.extract_strided_slice %60 {offsets = [1, 0], sizes = [1, 512], strides = [1, 1]} : vector<2x512xf32> to vector<1x512xf32>
    %68 = vector.broadcast %66 : vector<1x1xf32> to vector<1x512xf32>
    %69 = arith.mulf %68, %67 : vector<1x512xf32>
    %70 = arith.addf %65, %69 : vector<1x512xf32>
    %71 = vector.extract_strided_slice %3 {offsets = [0, 6], sizes = [2, 512], strides = [1, 1]} : vector<2x640xf32> to vector<2x512xf32>
    %72 = vector.extract_strided_slice %0 {offsets = [0, 12], sizes = [1, 1], strides = [1, 1]} : vector<1x28xf32> to vector<1x1xf32>
    %73 = vector.extract_strided_slice %71 {offsets = [0, 0], sizes = [1, 512], strides = [1, 1]} : vector<2x512xf32> to vector<1x512xf32>
    %74 = vector.broadcast %72 : vector<1x1xf32> to vector<1x512xf32>
    %75 = arith.mulf %74, %73 : vector<1x512xf32>
    %76 = arith.addf %70, %75 : vector<1x512xf32>
    %77 = vector.extract_strided_slice %0 {offsets = [0, 13], sizes = [1, 1], strides = [1, 1]} : vector<1x28xf32> to vector<1x1xf32>
    %78 = vector.extract_strided_slice %71 {offsets = [1, 0], sizes = [1, 512], strides = [1, 1]} : vector<2x512xf32> to vector<1x512xf32>
    %79 = vector.broadcast %77 : vector<1x1xf32> to vector<1x512xf32>
    %80 = arith.mulf %79, %78 : vector<1x512xf32>
    %81 = arith.addf %76, %80 : vector<1x512xf32>
    %82 = vector.extract_strided_slice %3 {offsets = [0, 7], sizes = [2, 512], strides = [1, 1]} : vector<2x640xf32> to vector<2x512xf32>
    %83 = vector.extract_strided_slice %0 {offsets = [0, 14], sizes = [1, 1], strides = [1, 1]} : vector<1x28xf32> to vector<1x1xf32>
    %84 = vector.extract_strided_slice %82 {offsets = [0, 0], sizes = [1, 512], strides = [1, 1]} : vector<2x512xf32> to vector<1x512xf32>
    %85 = vector.broadcast %83 : vector<1x1xf32> to vector<1x512xf32>
    %86 = arith.mulf %85, %84 : vector<1x512xf32>
    %87 = arith.addf %81, %86 : vector<1x512xf32>
    %88 = vector.extract_strided_slice %0 {offsets = [0, 15], sizes = [1, 1], strides = [1, 1]} : vector<1x28xf32> to vector<1x1xf32>
    %89 = vector.extract_strided_slice %82 {offsets = [1, 0], sizes = [1, 512], strides = [1, 1]} : vector<2x512xf32> to vector<1x512xf32>
    %90 = vector.broadcast %88 : vector<1x1xf32> to vector<1x512xf32>
    %91 = arith.mulf %90, %89 : vector<1x512xf32>
    %92 = arith.addf %87, %91 : vector<1x512xf32>
    %93 = vector.extract_strided_slice %3 {offsets = [0, 8], sizes = [2, 512], strides = [1, 1]} : vector<2x640xf32> to vector<2x512xf32>
    %94 = vector.extract_strided_slice %0 {offsets = [0, 16], sizes = [1, 1], strides = [1, 1]} : vector<1x28xf32> to vector<1x1xf32>
    %95 = vector.extract_strided_slice %93 {offsets = [0, 0], sizes = [1, 512], strides = [1, 1]} : vector<2x512xf32> to vector<1x512xf32>
    %96 = vector.broadcast %94 : vector<1x1xf32> to vector<1x512xf32>
    %97 = arith.mulf %96, %95 : vector<1x512xf32>
    %98 = arith.addf %92, %97 : vector<1x512xf32>
    %99 = vector.extract_strided_slice %0 {offsets = [0, 17], sizes = [1, 1], strides = [1, 1]} : vector<1x28xf32> to vector<1x1xf32>
    %100 = vector.extract_strided_slice %93 {offsets = [1, 0], sizes = [1, 512], strides = [1, 1]} : vector<2x512xf32> to vector<1x512xf32>
    %101 = vector.broadcast %99 : vector<1x1xf32> to vector<1x512xf32>
    %102 = arith.mulf %101, %100 : vector<1x512xf32>
    %103 = arith.addf %98, %102 : vector<1x512xf32>
    %104 = vector.extract_strided_slice %3 {offsets = [0, 9], sizes = [2, 512], strides = [1, 1]} : vector<2x640xf32> to vector<2x512xf32>
    %105 = vector.extract_strided_slice %0 {offsets = [0, 18], sizes = [1, 1], strides = [1, 1]} : vector<1x28xf32> to vector<1x1xf32>
    %106 = vector.extract_strided_slice %104 {offsets = [0, 0], sizes = [1, 512], strides = [1, 1]} : vector<2x512xf32> to vector<1x512xf32>
    %107 = vector.broadcast %105 : vector<1x1xf32> to vector<1x512xf32>
    %108 = arith.mulf %107, %106 : vector<1x512xf32>
    %109 = arith.addf %103, %108 : vector<1x512xf32>
    %110 = vector.extract_strided_slice %0 {offsets = [0, 19], sizes = [1, 1], strides = [1, 1]} : vector<1x28xf32> to vector<1x1xf32>
    %111 = vector.extract_strided_slice %104 {offsets = [1, 0], sizes = [1, 512], strides = [1, 1]} : vector<2x512xf32> to vector<1x512xf32>
    %112 = vector.broadcast %110 : vector<1x1xf32> to vector<1x512xf32>
    %113 = arith.mulf %112, %111 : vector<1x512xf32>
    %114 = arith.addf %109, %113 : vector<1x512xf32>
    %115 = vector.extract_strided_slice %3 {offsets = [0, 10], sizes = [2, 512], strides = [1, 1]} : vector<2x640xf32> to vector<2x512xf32>
    %116 = vector.extract_strided_slice %0 {offsets = [0, 20], sizes = [1, 1], strides = [1, 1]} : vector<1x28xf32> to vector<1x1xf32>
    %117 = vector.extract_strided_slice %115 {offsets = [0, 0], sizes = [1, 512], strides = [1, 1]} : vector<2x512xf32> to vector<1x512xf32>
    %118 = vector.broadcast %116 : vector<1x1xf32> to vector<1x512xf32>
    %119 = arith.mulf %118, %117 : vector<1x512xf32>
    %120 = arith.addf %114, %119 : vector<1x512xf32>
    %121 = vector.extract_strided_slice %0 {offsets = [0, 21], sizes = [1, 1], strides = [1, 1]} : vector<1x28xf32> to vector<1x1xf32>
    %122 = vector.extract_strided_slice %115 {offsets = [1, 0], sizes = [1, 512], strides = [1, 1]} : vector<2x512xf32> to vector<1x512xf32>
    %123 = vector.broadcast %121 : vector<1x1xf32> to vector<1x512xf32>
    %124 = arith.mulf %123, %122 : vector<1x512xf32>
    %125 = arith.addf %120, %124 : vector<1x512xf32>
    %126 = vector.extract_strided_slice %3 {offsets = [0, 11], sizes = [2, 512], strides = [1, 1]} : vector<2x640xf32> to vector<2x512xf32>
    %127 = vector.extract_strided_slice %0 {offsets = [0, 22], sizes = [1, 1], strides = [1, 1]} : vector<1x28xf32> to vector<1x1xf32>
    %128 = vector.extract_strided_slice %126 {offsets = [0, 0], sizes = [1, 512], strides = [1, 1]} : vector<2x512xf32> to vector<1x512xf32>
    %129 = vector.broadcast %127 : vector<1x1xf32> to vector<1x512xf32>
    %130 = arith.mulf %129, %128 : vector<1x512xf32>
    %131 = arith.addf %125, %130 : vector<1x512xf32>
    %132 = vector.extract_strided_slice %0 {offsets = [0, 23], sizes = [1, 1], strides = [1, 1]} : vector<1x28xf32> to vector<1x1xf32>
    %133 = vector.extract_strided_slice %126 {offsets = [1, 0], sizes = [1, 512], strides = [1, 1]} : vector<2x512xf32> to vector<1x512xf32>
    %134 = vector.broadcast %132 : vector<1x1xf32> to vector<1x512xf32>
    %135 = arith.mulf %134, %133 : vector<1x512xf32>
    %136 = arith.addf %131, %135 : vector<1x512xf32>
    %137 = vector.extract_strided_slice %3 {offsets = [0, 12], sizes = [2, 512], strides = [1, 1]} : vector<2x640xf32> to vector<2x512xf32>
    %138 = vector.extract_strided_slice %0 {offsets = [0, 24], sizes = [1, 1], strides = [1, 1]} : vector<1x28xf32> to vector<1x1xf32>
    %139 = vector.extract_strided_slice %137 {offsets = [0, 0], sizes = [1, 512], strides = [1, 1]} : vector<2x512xf32> to vector<1x512xf32>
    %140 = vector.broadcast %138 : vector<1x1xf32> to vector<1x512xf32>
    %141 = arith.mulf %140, %139 : vector<1x512xf32>
    %142 = arith.addf %136, %141 : vector<1x512xf32>
    %143 = vector.extract_strided_slice %0 {offsets = [0, 25], sizes = [1, 1], strides = [1, 1]} : vector<1x28xf32> to vector<1x1xf32>
    %144 = vector.extract_strided_slice %137 {offsets = [1, 0], sizes = [1, 512], strides = [1, 1]} : vector<2x512xf32> to vector<1x512xf32>
    %145 = vector.broadcast %143 : vector<1x1xf32> to vector<1x512xf32>
    %146 = arith.mulf %145, %144 : vector<1x512xf32>
    %147 = arith.addf %142, %146 : vector<1x512xf32>
    %148 = vector.extract_strided_slice %3 {offsets = [0, 13], sizes = [2, 512], strides = [1, 1]} : vector<2x640xf32> to vector<2x512xf32>
    %149 = vector.extract_strided_slice %0 {offsets = [0, 26], sizes = [1, 1], strides = [1, 1]} : vector<1x28xf32> to vector<1x1xf32>
    %150 = vector.extract_strided_slice %148 {offsets = [0, 0], sizes = [1, 512], strides = [1, 1]} : vector<2x512xf32> to vector<1x512xf32>
    %151 = vector.broadcast %149 : vector<1x1xf32> to vector<1x512xf32>
    %152 = arith.mulf %151, %150 : vector<1x512xf32>
    %153 = arith.addf %147, %152 : vector<1x512xf32>
    %154 = vector.extract_strided_slice %0 {offsets = [0, 27], sizes = [1, 1], strides = [1, 1]} : vector<1x28xf32> to vector<1x1xf32>
    %155 = vector.extract_strided_slice %148 {offsets = [1, 0], sizes = [1, 512], strides = [1, 1]} : vector<2x512xf32> to vector<1x512xf32>
    %156 = vector.broadcast %154 : vector<1x1xf32> to vector<1x512xf32>
    %157 = arith.mulf %156, %155 : vector<1x512xf32>
    %158 = arith.addf %153, %157 : vector<1x512xf32>
    %cst_5 = arith.constant 3.276800e+04 : f32
    %159 = vector.broadcast %cst_5 : f32 to vector<1x512xf32>
    %160 = arith.mulf %158, %159 : vector<1x512xf32>
    %161 = arith.fptosi %160 : vector<1x512xf32> to vector<1x512xi32>
    %c32768_i32 = arith.constant 32768 : i32
    %162 = vector.broadcast %c32768_i32 : i32 to vector<1x512xi32>
    %163 = arith.addi %161, %162 : vector<1x512xi32>
    %c65535_i32 = arith.constant 65535 : i32
    %164 = vector.broadcast %c65535_i32 : i32 to vector<1x512xi32>
    %165 = arith.andi %163, %164 : vector<1x512xi32>
    %c32768_i32_6 = arith.constant 32768 : i32
    %166 = vector.broadcast %c32768_i32_6 : i32 to vector<1x512xi32>
    %167 = arith.subi %165, %166 : vector<1x512xi32>
    %168 = arith.sitofp %167 : vector<1x512xi32> to vector<1x512xf32>
    %cst_7 = arith.constant 3.05175781E-5 : f32
    %169 = vector.broadcast %cst_7 : f32 to vector<1x512xf32>
    %170 = arith.mulf %168, %169 : vector<1x512xf32>
    %c0_8 = arith.constant 0 : index
    %c0_9 = arith.constant 0 : index
    %171 = vector.load %arg4[%c0_8, %c0_9] : memref<1x512xf32, #tpu.memory_space<vmem>>, vector<1x512xf32>
    %172 = arith.mulf %170, %171 : vector<1x512xf32>
    %c0_10 = arith.constant 0 : index
    %c0_11 = arith.constant 0 : index
    %173 = vector.load %arg5[%c0_10, %c0_11] : memref<1x512xf32, #tpu.memory_space<vmem>>, vector<1x512xf32>
    tpu.vector_store %arg5[%c0_10, %c0_11], %172 {strides = array<i32>} : memref<1x512xf32, #tpu.memory_space<vmem>>, vector<1x512xf32>,
    return
  }
  func.func @transform_0(%arg0: i32) -> (i32, i32) {
    %c0_i32 = arith.constant 0 : i32
    %c0_i32_0 = arith.constant 0 : i32
    %c0_i32_1 = arith.constant 0 : i32
    return %c0_i32, %c0_i32_0 : i32, i32
  }
  func.func @transform_1(%arg0: i32) -> (i32, i32) {
    %c0_i32 = arith.constant 0 : i32
    %c0_i32_0 = arith.constant 0 : i32
    return %c0_i32, %arg0 : i32, i32
  }
  func.func @transform_2(%arg0: i32) -> (i32, i32) {
    %c1_i32 = arith.constant 1 : i32
    %0 = arith.addi %arg0, %c1_i32 : i32
    %c4_i32 = arith.constant 4 : i32
    %1 = arith.muli %0, %c4_i32 : i32
    %c0_i32 = arith.constant 0 : i32
    %c0_i32_0 = arith.constant 0 : i32
    return %c0_i32, %1 : i32, i32
  }
  func.func @transform_3(%arg0: i32) -> (i32, i32) {
    %c0_i32 = arith.constant 0 : i32
    %c0_i32_0 = arith.constant 0 : i32
    return %c0_i32, %arg0 : i32, i32
  }
  func.func @transform_4(%arg0: i32) -> (i32, i32) {
    %c0_i32 = arith.constant 0 : i32
    %c0_i32_0 = arith.constant 0 : i32
    return %c0_i32, %arg0 : i32, i32
  }
}

</mosaic_0001>

<bundles_post_ra>
// kernel: tpu_custom_call.1
= control target key start
LH: loop header
LB: loop body
LE: loop exit
PB: predicated region body
PF: predicated region fallthrough
CT: control target
= control target key end

     0   :  { %s3123_s0 = inlined_call_operand.hbm [shape: f32[1,28], index: 0, kind: input, shape index: {}]   ;;  %s3124_s1 = inlined_call_operand.hbm [shape: f32[2,1152], index: 1, kind: input, shape index: {}]   ;;  %s3125_s2 = inlined_call_operand.hbm [shape: f32[2,1152], index: 2, kind: input, shape index: {}]   ;;  %s3126_s3 = inlined_call_operand.hbm [shape: f32[1,1024], index: 3, kind: input, shape index: {}]   ;;  %s3127_s4 = inlined_call_operand.hbm [shape: f32[1,1024], index: 4, kind: output, shape index: {}]  }
   0x1   :  { %3150 = sst [smem:[#allocation29_spill]] %s3123_s0 }
   0x2   :  { %3151 = sst [smem:[#allocation30_spill]] %s3124_s1 }
   0x3   :  { %9 = vsyncpa [#allocation3], 0 }
   0x4   :  { %10 = vsyncpa [#allocation6], 0 }
   0x5   :  { %12 = vsyncpa [#allocation6 + $0x1], 0 }
   0x6   :  { %13 = vsyncpa [#allocation9], 0 }
   0x7   :  { %15 = vsyncpa [#allocation9 + $0x1], 0 }
   0x8   :  { %16 = vsyncpa [#allocation4], 0 }
   0x9   :  { %18 = vsyncpa [#allocation4 + $0x1], 0  ;;  %s2220_s15 = smov 0   ;;  %s2222_s16 = smov 0  }
   0xa   :  { %s2224_s17 = smov 0   ;;  %s2226_s18 = smov 0  }
   0xb   :  { %s2228_s19 = smov 0   ;;  %s2230_s20 = smov 0  }
   0xc   :  { %s2232_s21 = smov 0  }
   0xd LB: > { %3152 = sst [smem:[#allocation16_spill]] %s2133_s18  ;;  %s2254_s22 = sadd.s32 4294967295, %s2145_s21   ;;  %s2145_s21 = sphi %s2232_s21, %s3194_s21   ;;  %s2141_s20 = sphi %s2230_s20, %s3202_s20   ;;  %s2137_s19 = sphi %s2228_s19, %s3201_s19   ;;  %s2133_s18 = sphi %s2226_s18, %s3200_s18   ;;  %s2129_s17 = sphi %s2224_s17, %s3199_s17   ;;  %s2125_s16 = sphi %s2222_s16, %s3198_s16   ;;  %s2121_s15 = sphi %s2220_s15, %s3197_s15  }
   0xe   : > { %s1737_s23 = sadd.s32 4294967294, %s2145_s21   ;;  %s2258_s24 = sadd.s32 1, %s2145_s21  }
   0xf   : > { %3153 = sst [smem:[#allocation17_spill]] %s2258_s24  ;;  %s52_s25 = sadd.s32 1, %s2141_s20 }
  0x10   : > { %s49_s26 = ssub.s32 %s2145_s21, %s2258_s24  ;;  %p59_p0 = scmp.ne.s32.totalorder %s2141_s20, %s2137_s19 }
  0x11   : > { %p50_p1 = scmp.eq.s32.totalorder %s49_s26, 0  ;;  %p60_p2 = scmp.eq.s32.totalorder %s2145_s21, 0 }
  0x12   : > { %p65_p3 = scmp.ne.s32.totalorder %s2137_s19, %s2133_s18  ;;  %p3136_p4 = scmp.eq.s32.totalorder %s2254_s22, 0 }
  0x13   : > { %s2270_s27 = scalar_select %p50_p1, %s2141_s20, %s52_s25  }
  0x14   : > { %p2277_p5 = por %p60_p2, %p59_p0  ;;  %p2286_p6 = por %p3136_p4, %p65_p3 }
  0x15   : > { %3154 = sst [smem:[#allocation18_spill]] %s2270_s27  ;;  %s1770_s30 = sshll.u32 %s2145_s21, 2 }
  0x16   : > { %s3155_s28 = scalar_select %p2277_p5, 1, 0 }
  0x17   : > { %s3156_s29 = scalar_select %p2286_p6, 1, 0 }
  0x18   : > { %s82_s5 = sadd.s32 1, %s2129_s17  ;;  %s1771_s6 = sadd.s32 4, %s1770_s30 }
  0x19   : > { %p89_p7 = scmp.ne.s32.totalorder %s2129_s17, %s2125_s16  ;;  %s1773_s7 = sadd.s32 4, %s1771_s6 }
  0x1a   : > { %p95_p8 = scmp.ne.s32.totalorder %s2125_s16, %s2121_s15  ;;  %s79_s8 = ssub.s32 %s1771_s6, %s1773_s7 }
  0x1b   : > { %p2299_p9 = por %p89_p7, %p60_p2  ;;  %p80_p10 = scmp.eq.s32.totalorder %s79_s8, 0 }
  0x1c   : > { %p2305_p11 = por %p95_p8, %p3136_p4  ;;  %p145_p12 = scmp.eq.s32.totalorder %s2254_s22, 1 }
  0x1d   : > { %p151_p13 = scmp.eq.s32.totalorder %s1737_s23, 1  ;;  %p1740_p7 = scmp.ge.s32.totalorder %s2145_s21, 1 }
  0x1e   : > { %s3158_s10 = scalar_select %p2305_p11, 1, 0 }
  0x1f   : > { %s2311_s11 = scalar_select %p80_p10, %s2129_s17, %s82_s5  }
  0x20   : > { %p2316_p1 = por %p145_p12, %p59_p0  ;;  %p2323_p2 = por %p151_p13, %p65_p3 }
  0x21   : > { %3159 = sst [smem:[#allocation19_spill]] %s2311_s11  ;;  %p158_p6 = scmp.lt.s32.totalorder %s2145_s21, 3 }
  0x22   : > { %s3160_s12 = scalar_select %p2316_p1, 1, 0 }
  0x23   : > { %s3161_s13 = scalar_select %p2323_p2, 1, 0 }
  0x24   : > { %p2329_p8 = pnand %p1740_p7, %p158_p6  ;;  %s2147_s15 = smov [#allocation2]  }
  0x25   : > { %3162 = sst [smem:[#allocation20_spill]] %s3161_s13  ;;  %s171_s23 = sshll.u32 %s2147_s15, 4  ;;  %s172_s23 = int_to_ptr.vmem [resolvable:$true] %s171_s23 }
  0x26   : > { %s3163_s14 = scalar_select %p2329_p8, 1, 0 }
  0x27   : > { %p1798_p10 = pneg %p2329_p8  ;;  %s1951_s25 = scalar_lea.vmem %s172_s23, 16 }
  0x28   : > { %p1952_p3 = scmp.ne.s32.totalorder %s172_s23, %s1951_s25  ;;  %s1958_s26 = scalar_lea.vmem %s172_s23, 32 }
  0x29   : > { %p1799_p0 = pnand %p1798_p10, %p3136_p4  ;;  %p1959_p2 = scmp.lt.s32.totalorder %s172_s23, %s172_s23 }
  0x2a   : > { %p1960_p11 = scmp.lt.s32.totalorder %s1958_s26, %s1951_s25 }
  0x2b   : > { %p1942_p12 = pneg %p1799_p0 }
  0x2c   : > { %p1961_p6 = por %p1960_p11, %p1959_p2 }
  0x2d   : > { %p1954_p13 = pnand %p1952_p3, %p1942_p12 }
  0x2f   : > { %p1955_p1 = pneg %p1954_p13 }
  0x31   : > { %p1962_p7 = pnand %p1961_p6, %p1955_p1 }
  0x33   : > { %1965 = shalt.err (!%p1962_p7)
}
  0x34   : > { %s3164_s0 = sld [smem:[#allocation29_spill]]  ;;  %p3135_p8 = scmp.ge.s32.totalorder %s2145_s21, 2 }
  0x36   : > { %178 = sbr.rel (%p3135_p8) target bundleno = 145 (0x91), region = 20 }
  0x3a   : > { %1801 = dma.hbm_to_vmem [thread:$0]  (!%p1799_p0), %s3164_s0, 16, %s172_s23, [#allocation3]  }
  0x3b   : > { %181 = sbr.rel (!%p2277_p5) target bundleno = 96 (0x60), region = 24  ;;  %s182_s7 = sand.u32 (%p2277_p5), 1, %s2145_s21  }
  0x3c   : > { %s184_s8 = sand.u32 (%p2277_p5), 1, %s2141_s20   ;;  %s188_s25 = ssub.s32 (%p2277_p5), 9, %s1770_s30 }
  0x3d   : > { %s1743_s15 = sshll.u32 (%p2277_p5), %s184_s8, 3  ;;  %p189_p11 = scmp.lt.s32.totalorder (%p2277_p5), %s188_s25, 4 }
  0x3e   : > { %s2352_s5 = scalar_lea.sflag (%p2277_p5), [#allocation6], %s182_s7  ;;  %s186_s6 = scalar_lea.vmem (%p2277_p5), [#allocation5], %s1743_s15 }
  0x40   : > { %s3204_s25 = smov (!%p189_p11, %s188_s25), 4 }
  0x41   : > { %s2349_s26 = sshll.u32 %s3204_s25, 5 }
  0x42   : > { %s193_s23 = ssub.s32 128, %s2349_s26 }
  0x43   : > { %194 = vsyncadd %s2352_s5, %s193_s23  ;;  %p1746_p1 = scmp.ne.s32.totalorder %s2349_s26, 0  ;;  %s1774_s0 = sshll.u32 %s2145_s21, 7 }
  0x44   : > { %s3165_s1 = sld [smem:[#allocation30_spill]]  ;;  %s200_s11 = sshll.u32 %s186_s6, 4  ;;  %s201_s11 = int_to_ptr.vmem [resolvable:$true] %s200_s11 }
  0x4a   : > { %s197_s30 = scalar_lea.hbm %s3165_s1, %s1774_s0  ;;  %s1970_s23 = scalar_lea.hbm %s3165_s1, 288 }
  0x4b   : > { %s1966_s25 = scalar_lea.hbm %s197_s30, %s2349_s26  ;;  %p1971_p12 = scmp.lt.s32.totalorder %s197_s30, %s3165_s1 }
  0x4c   : > { %p1967_p2 = scmp.ne.s32.totalorder %s197_s30, %s1966_s25  ;;  %p1972_p3 = scmp.lt.s32.totalorder %s1970_s23, %s1966_s25 }
  0x4e   : > { %p1968_p10 = pnand %p1967_p2, %p1746_p1  ;;  %p1973_p13 = por %p1972_p3, %p1971_p12 }
  0x50   : > { %p1969_p0 = pneg %p1968_p10 }
  0x52   : > { %p1974_p6 = pnand %p1973_p13, %p1969_p0 }
  0x54   : > { %1977 = shalt.err (!%p1974_p6)
}
  0x55   : > { %s1978_s0 = scalar_lea.vmem %s201_s11, %s2349_s26  ;;  %s2148_s27 = smov [#allocation5]  }
  0x56   : > { %p1979_p7 = scmp.ne.s32.totalorder %s201_s11, %s1978_s0  ;;  %s1982_s6 = sshll.u32 %s2148_s27, 4  ;;  %s1983_s6 = int_to_ptr.vmem [resolvable:$false] %s1982_s6 }
  0x57   : > { %s1984_s8 = scalar_lea.vmem %s1983_s6, 256  ;;  %p1985_p10 = scmp.lt.s32.totalorder %s201_s11, %s1983_s6 }
  0x58   : > { %p1980_p11 = pnand %p1979_p7, %p1746_p1  ;;  %p1986_p8 = scmp.lt.s32.totalorder %s1984_s8, %s1978_s0 }
  0x5a   : > { %p1981_p2 = pneg %p1980_p11  ;;  %p1987_p4 = por %p1986_p8, %p1985_p10 }
  0x5c   : > { %p1988_p5 = pnand %p1987_p4, %p1981_p2 }
  0x5e   : > { %1991 = shalt.err (!%p1988_p5)
}
  0x5f   : > { %203 = dma.hbm_to_vmem [thread:$0]  (%p1746_p1), %s197_s30, %s2349_s26, %s201_s11, %s2352_s5  }
  0x60 PF: > { %s207_s24 = sand.u32 1, %s2145_s21   ;;  %s209_s13 = sand.u32 1, %s2129_s17  }
  0x61   : > { %s1750_s25 = sshll.u32 %s209_s13, 1  ;;  %s1751_s7 = sshll.u32 %s2145_s21, 7 }
  0x62   : > { %s1650_s0 = scalar_lea.hbm %s3125_s2, %s1751_s7  ;;  %s211_s27 = scalar_lea.vmem [#allocation7], %s1750_s25 }
  0x63   : > { %s220_s6 = sshll.u32 %s211_s27, 4  ;;  %s1651_s8 = scalar_lea.hbm %s1650_s0, 128  ;;  %s221_s6 = int_to_ptr.vmem [resolvable:$true] %s220_s6 }
  0x64   : > { %s208_s1 = scalar_lea.sflag [#allocation6], %s207_s24  ;;  %s2018_s18 = scalar_lea.hbm %s1650_s0, 160 }
  0x65   : > { %p1993_p4 = scmp.ne.s32.totalorder %s1651_s8, %s2018_s18  ;;  %s1996_s5 = scalar_lea.hbm %s3125_s2, 288 }
  0x66   : > { %p1997_p1 = scmp.lt.s32.totalorder %s1651_s8, %s3125_s2  ;;  %p1998_p0 = scmp.lt.s32.totalorder %s1996_s5, %s2018_s18 }
  0x67   : > { %p1994_p5 = pnand %p1993_p4, %p2299_p9 }
  0x68   : > { %p1999_p12 = por %p1998_p0, %p1997_p1 }
  0x69   : > { %p1995_p8 = pneg %p1994_p5 }
  0x6b   : > { %p2000_p3 = pnand %p1999_p12, %p1995_p8 }
  0x6d   : > { %2003 = shalt.err (!%p2000_p3)
}
  0x6e   : > { %s2004_s25 = scalar_lea.vmem %s221_s6, 32  ;;  %s2149_s24 = smov [#allocation7]  }
  0x6f   : > { %p2005_p13 = scmp.ne.s32.totalorder %s221_s6, %s2004_s25  ;;  %s2008_s7 = sshll.u32 %s2149_s24, 4  ;;  %s2009_s7 = int_to_ptr.vmem [resolvable:$false] %s2008_s7 }
  0x70   : > { %s2010_s15 = scalar_lea.vmem %s2009_s7, 64  ;;  %p2011_p11 = scmp.lt.s32.totalorder %s221_s6, %s2009_s7 }
  0x71   : > { %p2006_p6 = pnand %p2005_p13, %p2299_p9  ;;  %p2012_p2 = scmp.lt.s32.totalorder %s2010_s15, %s2004_s25 }
  0x73   : > { %p2007_p7 = pneg %p2006_p6  ;;  %p2013_p10 = por %p2012_p2, %p2011_p11 }
  0x75   : > { %p2014_p4 = pnand %p2013_p10, %p2007_p7 }
  0x77   : > { %2017 = shalt.err (!%p2014_p4)
}
  0x78   : > { %1789 = dma.hbm_to_vmem [thread:$0]  (%p2299_p9), %s1651_s8, 32, %s221_s6, %s208_s1  }
  0x79   : > { %s227_s18 = sand.u32 1, %s2141_s20   ;;  %s1775_s23 = sshll.u32 %s2145_s21, 6 }
  0x7a   : > { %s1752_s0 = sshll.u32 %s227_s18, 2  ;;  %s2399_s26 = scalar_lea.hbm %s3126_s3, %s1775_s23 }
  0x7b   : > { %s231_s5 = scalar_lea.vmem [#allocation8], %s1752_s0  ;;  %s228_s13 = scalar_lea.sflag [#allocation9], %s227_s18 }
  0x7c   : > { %s239_s30 = sshll.u32 %s231_s5, 4  ;;  %s2019_s9 = scalar_lea.hbm %s2399_s26, 64  ;;  %s240_s30 = int_to_ptr.vmem [resolvable:$true] %s239_s30 }
  0x7d   : > { %p2020_p5 = scmp.ne.s32.totalorder %s2399_s26, %s2019_s9  ;;  %p3166_p8 = scmp.ne.s32.totalorder %s3155_s28, 0 }
  0x7e   : > { %s2023_s8 = scalar_lea.hbm %s3126_s3, 128  ;;  %p2024_p0 = scmp.lt.s32.totalorder %s2399_s26, %s3126_s3 }
  0x7f   : > { %p2021_p1 = pnand %p2020_p5, %p3166_p8  ;;  %p2025_p12 = scmp.lt.s32.totalorder %s2023_s8, %s2019_s9 }
  0x81   : > { %p2022_p9 = pneg %p2021_p1  ;;  %p2026_p3 = por %p2025_p12, %p2024_p0 }
  0x83   : > { %p2027_p13 = pnand %p2026_p3, %p2022_p9 }
  0x85   : > { %2030 = shalt.err (!%p2027_p13)
}
  0x86   : > { %s2031_s7 = scalar_lea.vmem %s240_s30, 64  ;;  %s2150_s15 = smov [#allocation8]  }
  0x87   : > { %p2032_p6 = scmp.ne.s32.totalorder %s240_s30, %s2031_s7  ;;  %s2035_s18 = sshll.u32 %s2150_s15, 4  ;;  %s2036_s18 = int_to_ptr.vmem [resolvable:$false] %s2035_s18 }
  0x88   : > { %s2037_s23 = scalar_lea.vmem %s2036_s18, 128  ;;  %p2038_p2 = scmp.lt.s32.totalorder %s240_s30, %s2036_s18 }
  0x89   : > { %p2033_p7 = pnand %p2032_p6, %p3166_p8  ;;  %p2039_p10 = scmp.lt.s32.totalorder %s2037_s23, %s2031_s7 }
  0x8b   : > { %p2034_p11 = pneg %p2033_p7  ;;  %p2040_p4 = por %p2039_p10, %p2038_p2 }
  0x8d   : > { %p2041_p5 = pnand %p2040_p4, %p2034_p11 }
  0x8f   : > { %2044 = shalt.err (!%p2041_p5)
}
  0x90   : > { %1790 = dma.hbm_to_vmem [thread:$0]  (%p3166_p8), %s2399_s26, 64, %s240_s30, %s228_s13  }
  0x91 PF: > { %p3167_p1 = scmp.ne.s32.totalorder %s3163_s14, 0 }
  0x93   : > { %248 = sbr.rel (%p3167_p1) target bundleno = 1068 (0x42c), region = 36 }
  0x98   : > { %p3168_p9 = scmp.eq.s32.totalorder %s2254_s22, 0 }
  0x9a   : > { %2100 = dma.done.wait (%p3168_p9), [#allocation3], 16   ;;  %p3169_p0 = pmov %p3168_p9 }
  0x9b   : > { %s254_s0 = sand.u32 1, %s2254_s22   ;;  %s2425_s27 = sand.u32 1, %s2137_s19  }
  0x9c   : > { %2102 = vsyncadd (%p3169_p0), [#allocation3], 4294967280  ;;  %s1757_s28 = sshll.u32 %s2425_s27, 3  ;;  %s255_s11 = scalar_lea.sflag [#allocation6], %s254_s0 }
  0x9d   : > { %s2428_s26 = scalar_lea.vmem [#allocation5], %s1757_s28  ;;  %p3170_p8 = scmp.ne.s32.totalorder %s3156_s29, 0 }
  0x9f   : > { %2104 = dma.done.wait (%p3170_p8), %s255_s11, 128  }
  0xa0   : > { %2106 = vsyncadd (%p3170_p8), %s255_s11, 4294967168  ;;  %s265_s14 = sand.u32 1, %s2125_s16   ;;  %p3171_p12 = scmp.ne.s32.totalorder %s3158_s10, 0 }
  0xa1   : > { %s2435_s5 = sshll.u32 %s265_s14, 1 }
  0xa2   : > { %s267_s30 = scalar_lea.vmem [#allocation7], %s2435_s5 }
  0xa3   : > { %2108 = dma.done.wait (%p3171_p12), %s255_s11, 32  }
  0xa4   : > { %2110 = vsyncadd (%p3171_p12), %s255_s11, 4294967264  ;;  %s1759_s13 = sshll.u32 %s2425_s27, 2  ;;  %s273_s9 = scalar_lea.sflag [#allocation9], %s2425_s27 }
  0xa5   : > { %s2446_s1 = scalar_lea.vmem [#allocation8], %s1759_s13 }
  0xa6   : > { %2112 = dma.done.wait (%p3170_p8), %s273_s9, 64  }
  0xa7   : > { %2114 = vsyncadd (%p3170_p8), %s273_s9, 4294967232  ;;  %v2151_v0 = vmov 2   ;;  %v2152_v1 = vmov 0   ;;  %v2452_v2 = vld [vmem:[#allocation2] sm:$0x1]  ;;  %v2153_v3 = vmov 3   ;;  %v3140_v18 = vlaneseq }
  0xa8   : > { %1911 = vset.pattern.permute.xlu1 %v2151_v0  ;;  %1909 = vset.pattern.permute.xlu0 %v2152_v1  ;;  %3172 = vst [vmem:[#allocation21_spill] sm:$0xff] %v2452_v2  ;;  %v2154_v4 = vmov 1   ;;  %v2155_v5 = vmov 4   ;;  %v2156_v6 = vmov 5   ;;  %v2157_v7 = vmov 6   ;;  %v321_v21 = vld [vmem:[%s2428_s26] sm:$0xff] }
  0xa9   : > { %391 = vperm.xlu1 %1911, %v2452_v2   ;;  %347 = vperm.xlu0 %1909, %v2452_v2   ;;  %v2158_v8 = vmov 7   ;;  %v2159_v9 = vmov 8   ;;  %v2160_v10 = vmov 9   ;;  %v2161_v11 = vmov 10   ;;  %v2489_v32 = vld [vmem:[%s267_s30] sm:$0x3] }
  0xaa   : > { %v2162_v12 = vmov 11   ;;  %v2163_v13 = vmov 12   ;;  %v2164_v14 = vmov 13   ;;  %v2165_v15 = vmov 14   ;;  %3174 = vst [vmem:[#allocation23_spill] sm:$0xff] %v2489_v32  ;;  %s2167_s29 = smov 127  }
  0xab   : > { %v2166_v16 = vmov 1983009808   ;;  %v2469_v20 = vshrl.u32 %v3140_v18, 7  ;;  %v324_v23 = vcombine.high %v321_v21, %v321_v21  ;;  %s2168_s10 = smov 126   ;;  %s2169_s6 = smov 125   ;;  %vm418_vm0 = vcmask 1039360  }
  0xac   : > { %v326_v17 = vunpack.c.l.s4 %v2166_v16  ;;  %s2170_s8 = smov 124   ;;  %s2171_s25 = smov 123   ;;  %vm504_vm1 = vcmask 1031168   ;;  %vm590_vm2 = vcmask 1022976   ;;  %vm676_vm3 = vcmask 1014784  }
  0xad   : > { %1912 = vset.pattern.permute.xlu1 %v2153_v3  ;;  %1910 = vset.pattern.permute.xlu0 %v2154_v4  ;;  %3173 = vst [vmem:[#allocation22_spill] sm:$0xff] %v2469_v20  ;;  %v2474_v24 = vsub.s32 0, %v2469_v20  ;;  %s2172_s24 = smov 122   ;;  %vm762_vm4 = vcmask 1006592   ;;  %s2174_s7 = smov 121   ;;  %vm848_vm5 = vcmask 998400  }
  0xae   : > { %432 = vperm.xlu1 %1912, %v2452_v2   ;;  %363 = vperm.xlu0 %1910, %v2452_v2   ;;  %v327_v19 = vunpack.c.0.s8 %v326_v17  ;;  %vm934_vm6 = vcmask 990208   ;;  %s2185_s15 = smov 120   ;;  %s2188_s18 = smov 119   ;;  %vm1020_vm7 = vcmask 982016   ;;  %vm1106_vm8 = vcmask 973824  }
  0xaf   : > { %s2189_s23 = smov 118   ;;  %s2190_s0 = smov 117   ;;  %vm1192_vm9 = vcmask 965632   ;;  %vm1278_vm10 = vcmask 957440   ;;  %vm1364_vm11 = vcmask 949248   ;;  %vm1450_vm12 = vcmask 941056  }
  0xb0   : > { %v330_v22 = vsub.s32 %v327_v19, %v2469_v20  ;;  %s2191_s28 = smov 116   ;;  %s2192_s11 = smov 115  }
  0xb1   : > { %s1776_s26 = sshll.u32 %s2254_s22, 6  ;;  %s310_s14 = scalar_lea.vmem [#allocation10], %s1759_s13 }
  0xb2   : > { %1913 = vset.pattern.permute.xlu1 %v2155_v5  ;;  %v2476_v25 = vrot.slane %v321_v21, %v330_v22  ;;  %v2478_v27 = vrot.slane %v324_v23, %v330_v22  ;;  %s1611_s5 = sshll.u32 %s310_s14, 4  ;;  %p3189_p13 = scmp.ne.s32.totalorder %s3160_s12, 0  ;;  %s1612_s5 = int_to_ptr.vmem [resolvable:$true] %s1611_s5 }
  0xb3   : > { %477 = vperm.xlu1 %1913, %v2452_v2   ;;  %s2194_s22 = smov [#allocation10]  }
  0xb4   : > { %v2485_v31 = vcombine.high %v2476_v25, %v2476_v25  ;;  %v2499_v36 = vcombine.high %v2478_v27, %v2478_v27 }
  0xb7   : > { %1914 = vset.pattern.permute.xlu1 %v2156_v6 }
  0xb8   : > { %518 = vperm.xlu1 %1914, %v2452_v2  }
  0xbc   : > { %1915 = vset.pattern.permute.xlu1 %v2157_v7 }
  0xbd   : > { %563 = vperm.xlu1 %1915, %v2452_v2  }
  0xc1   : > { %1916 = vset.pattern.permute.xlu1 %v2158_v8 }
  0xc2   : > { %604 = vperm.xlu1 %1916, %v2452_v2  }
  0xc6   : > { %1917 = vset.pattern.permute.xlu1 %v2159_v9 }
  0xc7   : > { %649 = vperm.xlu1 %1917, %v2452_v2  }
  0xcb   : > { %1918 = vset.pattern.permute.xlu1 %v2160_v10 }
  0xcc   : > { %690 = vperm.xlu1 %1918, %v2452_v2  }
  0xd0   : > { %1919 = vset.pattern.permute.xlu1 %v2161_v11 }
  0xd1   : > { %735 = vperm.xlu1 %1919, %v2452_v2  }
  0xd5   : > { %1920 = vset.pattern.permute.xlu1 %v2162_v12 }
  0xd6   : > { %776 = vperm.xlu1 %1920, %v2452_v2  }
  0xda   : > { %1921 = vset.pattern.permute.xlu1 %v2163_v13 }
  0xdb   : > { %821 = vperm.xlu1 %1921, %v2452_v2  }
  0xdf   : > { %1922 = vset.pattern.permute.xlu1 %v2164_v14 }
  0xe0   : > { %862 = vperm.xlu1 %1922, %v2452_v2  }
  0xe4   : > { %1923 = vset.pattern.permute.xlu1 %v2165_v15 }
 0x124   : > { %v392_v26 = vpop.permute.xlu1 %391 }
 0x125   : > { %v397_v28 = vrot.slane %v392_v26, %v2474_v24 }
 0x127   : > { %v398_v29 = vmul.f32 %v397_v28, %v2476_v25  ;;  %v400_v30 = vmul.f32 %v397_v28, %v2478_v27  ;;  %v399_v34 = vmul.f32 %v397_v28, %v2485_v31  ;;  %v402_v35 = vmul.f32 %v397_v28, %v2489_v32 }
 0x128   : > { %v401_v39 = vmul.f32 %v397_v28, %v2499_v36 }
 0x129   : > { %408 = vrot.lane.b32.xlu1 %v398_v29, %s2167_s29  ;;  %v2492_v33 = vpop.permute.xlu1 %432  ;;  %412 = vrot.lane.b32.xlu0 %v400_v30, %s2167_s29 }
 0x12a   : > { %v438_v7 = vrot.slane %v2492_v33, %v2474_v24 }
 0x12c   : > { %v440_v12 = vmul.f32 %v438_v7, %v2485_v31  ;;  %v442_v16 = vmul.f32 %v438_v7, %v2499_v36  ;;  %v439_v22 = vmul.f32 %v438_v7, %v2476_v25 }
 0x12d   : > { %410 = vrot.lane.b32.xlu1 %v399_v34, %s2167_s29  ;;  %416 = vrot.lane.b32.xlu0 %v402_v35, %s2167_s29  ;;  %v441_v35 = vmul.f32 %v438_v7, %v2478_v27 }
 0x12e   : > { %v478_v37 = vpop.permute.xlu1 %477  ;;  %v450_v14 = vrot.slane %v440_v12, 1  ;;  %v452_v17 = vrot.slane %v442_v16, 1  ;;  %v449_v33 = vrot.slane %v439_v22, 1 }
 0x12f   : > { %v483_v38 = vrot.slane %v478_v37, %v2474_v24  ;;  %v443_v37 = vmul.f32 %v438_v7, %v2489_v32 }
 0x131   : > { %414 = vrot.lane.b32.xlu1 %v401_v39, %s2167_s29  ;;  %v484_v40 = vmul.f32 %v483_v38, %v2476_v25  ;;  %v485_v42 = vmul.f32 %v483_v38, %v2485_v31  ;;  %v486_v43 = vmul.f32 %v483_v38, %v2478_v27  ;;  %v487_v44 = vmul.f32 %v483_v38, %v2499_v36 }
 0x132   : > { %v488_v47 = vmul.f32 %v483_v38, %v2489_v32 }
 0x133   : > { %v519_v41 = vpop.permute.xlu1 %518  ;;  %494 = vrot.lane.b32.xlu0 %v484_v40, %s2168_s10  ;;  %v451_v40 = vrot.slane %v441_v35, 1 }
 0x134   : > { %v524_v13 = vrot.slane %v519_v41, %v2474_v24 }
 0x135   : > { %496 = vrot.lane.b32.xlu1 %v485_v42, %s2168_s10 }
 0x136   : > { %v526_v21 = vmul.f32 %v524_v13, %v2485_v31  ;;  %v528_v29 = vmul.f32 %v524_v13, %v2499_v36 }
 0x137   : > { %498 = vrot.lane.b32.xlu0 %v486_v43, %s2168_s10  ;;  %v453_v43 = vrot.slane %v443_v37, 1 }
 0x138   : > { %v564_v45 = vpop.permute.xlu1 %563  ;;  %v536_v26 = vrot.slane %v526_v21, 1  ;;  %v538_v30 = vrot.slane %v528_v29, 1  ;;  %v2173_v21 = vmov 15  }
 0x139   : > { %v569_v46 = vrot.slane %v564_v45, %v2474_v24  ;;  %500 = vrot.lane.b32.xlu1 %v487_v44, %s2168_s10  ;;  %v525_v45 = vmul.f32 %v524_v13, %v2476_v25 }
 0x13b   : > { %502 = vrot.lane.b32.xlu0 %v488_v47, %s2168_s10  ;;  %v571_v48 = vmul.f32 %v569_v46, %v2485_v31  ;;  %v570_v50 = vmul.f32 %v569_v46, %v2476_v25  ;;  %v573_v51 = vmul.f32 %v569_v46, %v2499_v36  ;;  %v572_v52 = vmul.f32 %v569_v46, %v2478_v27 }
 0x13c   : > { %v574_v56 = vmul.f32 %v569_v46, %v2489_v32  ;;  %v527_v46 = vmul.f32 %v524_v13, %v2478_v27 }
 0x13d   : > { %582 = vrot.lane.b32.xlu1 %v571_v48, %s2169_s6  ;;  %v605_v49 = vpop.permute.xlu1 %604 }
 0x13e   : > { %v610_v23 = vrot.slane %v605_v49, %v2474_v24  ;;  %v535_v49 = vrot.slane %v525_v45, 1 }
 0x13f   : > { %580 = vrot.lane.b32.xlu0 %v570_v50, %s2169_s6 }
 0x140   : > { %v612_v34 = vmul.f32 %v610_v23, %v2485_v31  ;;  %v614_v41 = vmul.f32 %v610_v23, %v2499_v36 }
 0x141   : > { %586 = vrot.lane.b32.xlu1 %v573_v51, %s2169_s6 }
 0x142   : > { %v650_v53 = vpop.permute.xlu1 %649  ;;  %v622_v39 = vrot.slane %v612_v34, 1  ;;  %v624_v42 = vrot.slane %v614_v41, 1 }
 0x143   : > { %v655_v54 = vrot.slane %v650_v53, %v2474_v24  ;;  %584 = vrot.lane.b32.xlu0 %v572_v52, %s2169_s6  ;;  %v537_v53 = vrot.slane %v527_v46, 1 }
 0x145   : > { %v657_v55 = vmul.f32 %v655_v54, %v2485_v31  ;;  %v659_v58 = vmul.f32 %v655_v54, %v2499_v36  ;;  %v656_v59 = vmul.f32 %v655_v54, %v2476_v25  ;;  %v658_v62 = vmul.f32 %v655_v54, %v2478_v27 }
 0x146   : > { %v660_v1 = vmul.f32 %v655_v54, %v2489_v32 }
 0x147   : > { %668 = vrot.lane.b32.xlu1 %v657_v55, %s2170_s8  ;;  %v691_v57 = vpop.permute.xlu1 %690  ;;  %588 = vrot.lane.b32.xlu0 %v574_v56, %s2169_s6  ;;  %v529_v55 = vmul.f32 %v524_v13, %v2489_v32 }
 0x148   : > { %v696_v38 = vrot.slane %v691_v57, %v2474_v24 }
 0x14a   : > { %v698_v44 = vmul.f32 %v696_v38, %v2485_v31  ;;  %v700_v50 = vmul.f32 %v696_v38, %v2499_v36 }
 0x14b   : > { %672 = vrot.lane.b32.xlu1 %v659_v58, %s2170_s8  ;;  %666 = vrot.lane.b32.xlu0 %v656_v59, %s2170_s8  ;;  %v539_v58 = vrot.slane %v529_v55, 1 }
 0x14c   : > { %v736_v60 = vpop.permute.xlu1 %735  ;;  %v708_v48 = vrot.slane %v698_v44, 1  ;;  %v710_v52 = vrot.slane %v700_v50, 1 }
 0x14d   : > { %v741_v61 = vrot.slane %v736_v60, %v2474_v24  ;;  %v611_v60 = vmul.f32 %v610_v23, %v2476_v25 }
 0x14f   : > { %670 = vrot.lane.b32.xlu0 %v658_v62, %s2170_s8  ;;  %v743_v63 = vmul.f32 %v741_v61, %v2485_v31  ;;  %v745_v3 = vmul.f32 %v741_v61, %v2499_v36  ;;  %v742_v4 = vmul.f32 %v741_v61, %v2476_v25  ;;  %v744_v9 = vmul.f32 %v741_v61, %v2478_v27 }
 0x150   : > { %v746_v11 = vmul.f32 %v741_v61, %v2489_v32 }
 0x151   : > { %754 = vrot.lane.b32.xlu1 %v743_v63, %s2171_s25  ;;  %v777_v0 = vpop.permute.xlu1 %776  ;;  %v621_v63 = vrot.slane %v611_v60, 1 }
 0x152   : > { %v782_v47 = vrot.slane %v777_v0, %v2474_v24  ;;  %v613_v0 = vmul.f32 %v610_v23, %v2478_v27 }
 0x153   : > { %674 = vrot.lane.b32.xlu0 %v660_v1, %s2170_s8 }
 0x154   : > { %v784_v54 = vmul.f32 %v782_v47, %v2485_v31  ;;  %v786_v59 = vmul.f32 %v782_v47, %v2499_v36  ;;  %v783_v16 = vmul.f32 %v782_v47, %v2476_v25 }
 0x155   : > { %758 = vrot.lane.b32.xlu1 %v745_v3, %s2171_s25  ;;  %v623_v3 = vrot.slane %v613_v0, 1 }
 0x156   : > { %v822_v5 = vpop.permute.xlu1 %821  ;;  %v794_v57 = vrot.slane %v784_v54, 1  ;;  %v796_v62 = vrot.slane %v786_v59, 1  ;;  %v793_v22 = vrot.slane %v783_v16, 1 }
 0x157   : > { %v827_v6 = vrot.slane %v822_v5, %v2474_v24  ;;  %752 = vrot.lane.b32.xlu0 %v742_v4, %s2171_s25  ;;  %v615_v5 = vmul.f32 %v610_v23, %v2489_v32  ;;  %v785_v23 = vmul.f32 %v782_v47, %v2478_v27 }
 0x159   : > { %v829_v8 = vmul.f32 %v827_v6, %v2485_v31  ;;  %v831_v10 = vmul.f32 %v827_v6, %v2499_v36  ;;  %v828_v15 = vmul.f32 %v827_v6, %v2476_v25  ;;  %v830_v19 = vmul.f32 %v827_v6, %v2478_v27 }
 0x15a   : > { %v832_v28 = vmul.f32 %v827_v6, %v2489_v32  ;;  %v625_v7 = vrot.slane %v615_v5, 1  ;;  %v795_v29 = vrot.slane %v785_v23, 1 }
 0x15b   : > { %840 = vrot.lane.b32.xlu1 %v829_v8, %s2172_s24  ;;  %756 = vrot.lane.b32.xlu0 %v744_v9, %s2171_s25  ;;  %v863_v51 = vpop.permute.xlu1 %862  ;;  %v697_v8 = vmul.f32 %v696_v38, %v2476_v25  ;;  %v2610_v9 = vpop.permute.xlu0 %347 }
 0x15c   : > { %v868_v56 = vrot.slane %v863_v51, %v2474_v24  ;;  %v353_v16 = vrot.slane %v2610_v9, %v2474_v24 }
 0x15e   : > { %v870_v61 = vmul.f32 %v868_v56, %v2485_v31  ;;  %v872_v4 = vmul.f32 %v868_v56, %v2499_v36  ;;  %v869_v37 = vmul.f32 %v868_v56, %v2476_v25  ;;  %v871_v41 = vmul.f32 %v868_v56, %v2478_v27 }
 0x15f   : > { %844 = vrot.lane.b32.xlu1 %v831_v10, %s2172_s24  ;;  %760 = vrot.lane.b32.xlu0 %v746_v11, %s2171_s25  ;;  %v707_v10 = vrot.slane %v697_v8, 1  ;;  %v699_v11 = vmul.f32 %v696_v38, %v2478_v27  ;;  %v364_v13 = vpop.permute.xlu0 %363  ;;  %v873_v45 = vmul.f32 %v868_v56, %v2489_v32 }
 0x160   : > { %v880_v1 = vrot.slane %v870_v61, 1  ;;  %v882_v6 = vrot.slane %v872_v4, 1  ;;  %v881_v44 = vrot.slane %v871_v41, 1  ;;  %v355_v41 = vmul.f32 %v353_v16, %v2485_v31 }
 0x161   : > { %v709_v12 = vrot.slane %v699_v11, 1 }
 0x163   : > { %456 = vrot.lane.b32.xlu1 %v450_v14, %s2167_s29  ;;  %838 = vrot.lane.b32.xlu0 %v828_v15, %s2172_s24  ;;  %v701_v14 = vmul.f32 %v696_v38, %v2489_v32 }
 0x165   : > { %v711_v15 = vrot.slane %v701_v14, 1 }
 0x167   : > { %460 = vrot.lane.b32.xlu1 %v452_v17, %s2167_s29  ;;  %842 = vrot.lane.b32.xlu0 %v830_v19, %s2172_s24 }
 0x16b   : > { %542 = vrot.lane.b32.xlu1 %v536_v26, %s2168_s10  ;;  %846 = vrot.lane.b32.xlu0 %v832_v28, %s2172_s24 }
 0x16f   : > { %546 = vrot.lane.b32.xlu1 %v538_v30, %s2168_s10  ;;  %454 = vrot.lane.b32.xlu0 %v449_v33, %s2167_s29  ;;  %v787_v30 = vmul.f32 %v782_v47, %v2489_v32 }
 0x171   : > { %v797_v35 = vrot.slane %v787_v30, 1  ;;  %v354_v30 = vmul.f32 %v353_v16, %v2476_v25 }
 0x173   : > { %628 = vrot.lane.b32.xlu1 %v622_v39, %s2169_s6  ;;  %458 = vrot.lane.b32.xlu0 %v451_v40, %s2167_s29  ;;  %v879_v40 = vrot.slane %v869_v37, 1 }
 0x177   : > { %632 = vrot.lane.b32.xlu1 %v624_v42, %s2169_s6  ;;  %462 = vrot.lane.b32.xlu0 %v453_v43, %s2167_s29  ;;  %s1597_s29 = scalar_lea.sflag [#allocation4], %s2425_s27 }
 0x17b   : > { %714 = vrot.lane.b32.xlu1 %v708_v48, %s2170_s8  ;;  %540 = vrot.lane.b32.xlu0 %v535_v49, %s2168_s10  ;;  %v883_v48 = vrot.slane %v873_v45, 1  ;;  %v356_v45 = vmul.f32 %v353_v16, %v2478_v27 }
 0x17f   : > { %718 = vrot.lane.b32.xlu1 %v710_v52, %s2170_s8  ;;  %544 = vrot.lane.b32.xlu0 %v537_v53, %s2168_s10 }
 0x183   : > { %800 = vrot.lane.b32.xlu1 %v794_v57, %s2171_s25  ;;  %548 = vrot.lane.b32.xlu0 %v539_v58, %s2168_s10  ;;  %s2045_s10 = scalar_lea.vmem %s1612_s5, 64 }
 0x184   : > { %p2046_p3 = scmp.ne.s32.totalorder %s1612_s5, %s2045_s10 }
 0x186   : > { %p2047_p6 = pnand %p2046_p3, %p3189_p13 }
 0x187   : > { %804 = vrot.lane.b32.xlu1 %v796_v62, %s2171_s25  ;;  %626 = vrot.lane.b32.xlu0 %v621_v63, %s2169_s6 }
 0x188   : > { %p2048_p7 = pneg %p2047_p6 }
 0x18b   : > { %886 = vrot.lane.b32.xlu1 %v880_v1, %s2172_s24  ;;  %630 = vrot.lane.b32.xlu0 %v623_v3, %s2169_s6 }
 0x18f   : > { %890 = vrot.lane.b32.xlu1 %v882_v6, %s2172_s24  ;;  %634 = vrot.lane.b32.xlu0 %v625_v7, %s2169_s6  ;;  %s2049_s6 = sshll.u32 %s2194_s22, 4  ;;  %s2050_s6 = int_to_ptr.vmem [resolvable:$false] %s2049_s6 }
 0x190   : > { %s2051_s13 = scalar_lea.vmem %s2050_s6, 128  ;;  %p2052_p11 = scmp.lt.s32.totalorder %s1612_s5, %s2050_s6 }
 0x191   : > { %p2053_p2 = scmp.lt.s32.totalorder %s2051_s13, %s2045_s10 }
 0x193   : > { %907 = vperm.xlu1 %1923, %v2452_v2   ;;  %712 = vrot.lane.b32.xlu0 %v707_v10, %s2170_s8  ;;  %p2054_p10 = por %p2053_p2, %p2052_p11 }
 0x195   : > { %p2055_p4 = pnand %p2054_p10, %p2048_p7 }
 0x197   : > { %716 = vrot.lane.b32.xlu0 %v709_v12, %s2170_s8  ;;  %1924 = vset.pattern.permute.xlu1 %v2173_v21  ;;  %v369_v12 = vrot.slane %v364_v13, %v2474_v24 }
 0x199   : > { %v370_v21 = vmul.f32 %v369_v12, %v2476_v25  ;;  %v372_v37 = vmul.f32 %v369_v12, %v2478_v27 }
 0x19b   : > { %v2618_v17 = vpop.permute.xlu1 %408  ;;  %720 = vrot.lane.b32.xlu0 %v711_v15, %s2170_s8  ;;  %v2621_v19 = vpop.permute.xlu0 %412  ;;  %v380_v18 = vrot.slane %v372_v37, 1 }
 0x19f   : > { %v2624_v26 = vpop.permute.xlu1 %410  ;;  %798 = vrot.lane.b32.xlu0 %v793_v22, %s2171_s25  ;;  %v2627_v28 = vpop.permute.xlu0 %416 }
 0x1a3   : > { %v2630_v33 = vpop.permute.xlu1 %414  ;;  %802 = vrot.lane.b32.xlu0 %v795_v29, %s2171_s25  ;;  %v371_v29 = vmul.f32 %v369_v12, %v2485_v31 }
 0x1a5   : > { %v2633_v34 = vpop.permute.xlu0 %494 }
 0x1a7   : > { %v2636_v38 = vpop.permute.xlu1 %496  ;;  %806 = vrot.lane.b32.xlu0 %v797_v35, %s2171_s25  ;;  %v378_v35 = vrot.slane %v370_v21, 1  ;;  %v419_v21 = vsel %vm418_vm0, %v2618_v17, %v2624_v26 }
 0x1a9   : > { %v2639_v39 = vpop.permute.xlu0 %498  ;;  %v386_v9 = vadd.f32 %v378_v35, %v354_v30 }
 0x1ab   : > { %v2642_v42 = vpop.permute.xlu1 %500  ;;  %884 = vrot.lane.b32.xlu0 %v879_v40, %s2172_s24  ;;  %v427_v30 = vadd.f32 %v419_v21, %v386_v9 }
 0x1ad   : > { %v2645_v43 = vpop.permute.xlu0 %502 }
 0x1af   : > { %v2648_v46 = vpop.permute.xlu1 %582  ;;  %888 = vrot.lane.b32.xlu0 %v881_v44, %s2172_s24  ;;  %v379_v44 = vrot.slane %v371_v29, 1  ;;  %v420_v29 = vsel %vm418_vm0, %v2624_v26, %v2621_v19  ;;  %v422_v26 = vsel %vm418_vm0, %v2630_v33, %v2627_v28 }
 0x1b1   : > { %v2651_v47 = vpop.permute.xlu0 %580 }
 0x1b3   : > { %892 = vrot.lane.b32.xlu0 %v883_v48, %s2172_s24  ;;  %v2654_v49 = vpop.permute.xlu1 %586  ;;  %v373_v48 = vmul.f32 %v369_v12, %v2499_v36  ;;  %v388_v12 = vadd.f32 %v380_v18, %v356_v45  ;;  %v505_v18 = vsel %vm504_vm1, %v2633_v34, %v2636_v38  ;;  %v507_v34 = vsel %vm504_vm1, %v2639_v39, %v2642_v42 }
 0x1b5   : > { %v2656_v50 = vpop.permute.xlu0 %584  ;;  %v381_v35 = vrot.slane %v373_v48, 1 }
 0x1b9   : > { %v2658_v51 = vpop.permute.xlu1 %668  ;;  %v2660_v52 = vpop.permute.xlu0 %588 }
 0x1bd   : > { %v2662_v53 = vpop.permute.xlu0 %666  ;;  %v2664_v54 = vpop.permute.xlu1 %672 }
 0x1c1   : > { %v2666_v55 = vpop.permute.xlu0 %670 }
 0x1c3   : > { %v2668_v56 = vpop.permute.xlu1 %754 }
 0x1c5   : > { %v2670_v57 = vpop.permute.xlu0 %674 }
 0x1c7   : > { %v2672_v58 = vpop.permute.xlu1 %758 }
 0x1c9   : > { %v2674_v59 = vpop.permute.xlu0 %752 }
 0x1cd   : > { %v2676_v60 = vpop.permute.xlu1 %840  ;;  %v2678_v61 = vpop.permute.xlu0 %756 }
 0x1ce   : > { %3175 = vst [vmem:[#allocation24_spill] sm:$0xff] %v2676_v60  ;;  %v421_v60 = vsel %vm418_vm0, %v2621_v19, %v2630_v33 }
 0x1cf   : > { %v429_v2 = vadd.f32 %v421_v60, %v388_v12 }
 0x1d1   : > { %v2680_v62 = vpop.permute.xlu1 %844  ;;  %v2682_v63 = vpop.permute.xlu0 %760 }
 0x1d2   : > { %3176 = vst [vmem:[#allocation25_spill] sm:$0xff] %v2680_v62  ;;  %v357_v62 = vmul.f32 %v353_v16, %v2499_v36 }
 0x1d5   : > { %v457_v0 = vpop.permute.xlu1 %456  ;;  %v2684_v1 = vpop.permute.xlu0 %838 }
 0x1d6   : > { %3177 = vst [vmem:[#allocation26_spill] sm:$0xff] %v2684_v1 }
 0x1d9   : > { %v461_v3 = vpop.permute.xlu1 %460  ;;  %v2686_v4 = vpop.permute.xlu0 %842 }
 0x1da   : > { %3178 = vst [vmem:[#allocation27_spill] sm:$0xff] %v2686_v4 }
 0x1dd   : > { %v543_v5 = vpop.permute.xlu1 %542  ;;  %v2688_v6 = vpop.permute.xlu0 %846 }
 0x1de   : > { %3179 = vst [vmem:[#allocation28_spill] sm:$0xff] %v2688_v6  ;;  %v387_v6 = vadd.f32 %v379_v44, %v355_v41  ;;  %v389_v44 = vadd.f32 %v381_v35, %v357_v62 }
 0x1e0   : > { %v428_v41 = vadd.f32 %v420_v29, %v387_v6  ;;  %v430_v60 = vadd.f32 %v422_v26, %v389_v44 }
 0x1e1   : > { %v2690_v7 = vpop.permute.xlu1 %546  ;;  %v455_v8 = vpop.permute.xlu0 %454 }
 0x1e2   : > { %v464_v4 = vsel %vm418_vm0, %v455_v8, %v457_v0 }
 0x1e3   : > { %v472_v17 = vadd.f32 %v464_v4, %v427_v30 }
 0x1e5   : > { %v2692_v10 = vpop.permute.xlu1 %628  ;;  %v459_v11 = vpop.permute.xlu0 %458  ;;  %v513_v6 = vadd.f32 %v505_v18, %v472_v17 }
 0x1e6   : > { %v465_v16 = vsel %vm418_vm0, %v457_v0, %v459_v11  ;;  %v466_v8 = vsel %vm418_vm0, %v459_v11, %v461_v3  ;;  %v506_v11 = vsel %vm504_vm1, %v2636_v38, %v2639_v39  ;;  %v508_v39 = vsel %vm504_vm1, %v2642_v42, %v2645_v43 }
 0x1e7   : > { %v473_v9 = vadd.f32 %v465_v16, %v428_v41  ;;  %v474_v0 = vadd.f32 %v466_v8, %v429_v2  ;;  %v593_v16 = vsel %vm590_vm2, %v2656_v50, %v2654_v49 }
 0x1e9   : > { %v2695_v14 = vpop.permute.xlu1 %632  ;;  %v463_v15 = vpop.permute.xlu0 %462  ;;  %v515_v21 = vadd.f32 %v507_v34, %v474_v0 }
 0x1ea   : > { %v467_v62 = vsel %vm418_vm0, %v461_v3, %v463_v15  ;;  %v591_v3 = vsel %vm590_vm2, %v2651_v47, %v2648_v46  ;;  %v592_v47 = vsel %vm590_vm2, %v2648_v46, %v2656_v50  ;;  %v677_v46 = vsel %vm676_vm3, %v2662_v53, %v2658_v51 }
 0x1eb   : > { %v475_v48 = vadd.f32 %v467_v62, %v430_v60  ;;  %v678_v53 = vsel %vm676_vm3, %v2658_v51, %v2666_v55  ;;  %v679_v60 = vsel %vm676_vm3, %v2666_v55, %v2664_v54  ;;  %v763_v51 = vsel %vm762_vm4, %v2674_v59, %v2668_v56 }
 0x1ed   : > { %v2700_v22 = vpop.permute.xlu1 %714  ;;  %v541_v23 = vpop.permute.xlu0 %540  ;;  %v516_v12 = vadd.f32 %v508_v39, %v475_v48 }
 0x1ee   : > { %v550_v19 = vsel %vm504_vm1, %v541_v23, %v543_v5  ;;  %v514_v23 = vadd.f32 %v506_v11, %v473_v9 }
 0x1ef   : > { %v558_v28 = vadd.f32 %v550_v19, %v513_v6 }
 0x1f1   : > { %v545_v40 = vpop.permute.xlu0 %544  ;;  %v2705_v13 = vpop.permute.xlu1 %718  ;;  %v599_v30 = vadd.f32 %v591_v3, %v558_v28 }
 0x1f2   : > { %v551_v33 = vsel %vm504_vm1, %v543_v5, %v545_v40  ;;  %v552_v2 = vsel %vm504_vm1, %v545_v40, %v2690_v7 }
 0x1f3   : > { %v559_v15 = vadd.f32 %v551_v33, %v514_v23  ;;  %v560_v29 = vadd.f32 %v552_v2, %v515_v21  ;;  %v764_v21 = vsel %vm762_vm4, %v2668_v56, %v2678_v61 }
 0x1f5   : > { %v549_v20 = vpop.permute.xlu0 %548  ;;  %v2715_v1 = vpop.permute.xlu1 %800  ;;  %v600_v41 = vadd.f32 %v592_v47, %v559_v15  ;;  %v601_v8 = vadd.f32 %v593_v16, %v560_v29  ;;  %v765_v15 = vsel %vm762_vm4, %v2678_v61, %v2672_v58  ;;  %v766_v61 = vsel %vm762_vm4, %v2672_v58, %v2682_v63 }
 0x1f6   : > { %v553_v40 = vsel %vm504_vm1, %v2690_v7, %v549_v20  ;;  %v2175_v63 = vmov 17  }
 0x1f7   : > { %v561_v43 = vadd.f32 %v553_v40, %v516_v12  ;;  %1926 = vset.pattern.permute.xlu0 %v2175_v63 }
 0x1f9   : > { %v627_v37 = vpop.permute.xlu0 %626  ;;  %v2732_v4 = vpop.permute.xlu1 %804 }
 0x1fa   : > { %v636_v38 = vsel %vm590_vm2, %v627_v37, %v2692_v10 }
 0x1fb   : > { %v644_v17 = vadd.f32 %v636_v38, %v599_v30 }
 0x1fd   : > { %v631_v32 = vpop.permute.xlu0 %630  ;;  %v2749_v5 = vpop.permute.xlu1 %886  ;;  %v685_v18 = vadd.f32 %v677_v46, %v644_v17 }
 0x1fe   : > { %v637_v37 = vsel %vm590_vm2, %v2692_v10, %v631_v32  ;;  %v638_v42 = vsel %vm590_vm2, %v631_v32, %v2695_v14  ;;  %v594_v32 = vsel %vm590_vm2, %v2654_v49, %v2660_v52 }
 0x1ff   : > { %v645_v7 = vadd.f32 %v637_v37, %v600_v41  ;;  %v646_v26 = vadd.f32 %v638_v42, %v601_v8  ;;  %v602_v19 = vadd.f32 %v594_v32, %v561_v43  ;;  %v3180_v37 = vld [vmem:[#allocation23_spill] sm:$0xff]  ;;  %v3181_v42 = vld [vmem:[#allocation21_spill] sm:$0xff]  ;;  %v3182_v43 = vld [vmem:[#allocation24_spill] sm:$0xff] }
 0x200   : > { %v3183_v8 = vld [vmem:[#allocation26_spill] sm:$0xff] }
 0x201   : > { %v635_v45 = vpop.permute.xlu0 %634  ;;  %v2769_v44 = vpop.permute.xlu1 %890  ;;  %v686_v11 = vadd.f32 %v678_v53, %v645_v7  ;;  %v687_v28 = vadd.f32 %v679_v60, %v646_v26 }
 0x202   : > { %v639_v9 = vsel %vm590_vm2, %v2695_v14, %v635_v45 }
 0x203   : > { %v647_v14 = vadd.f32 %v639_v9, %v602_v19 }
 0x205   : > { %v713_v35 = vpop.permute.xlu0 %712 }
 0x206   : > { %v722_v10 = vsel %vm676_vm3, %v713_v35, %v2700_v22 }
 0x207   : > { %v730_v0 = vadd.f32 %v722_v10, %v685_v18  ;;  %v3185_v18 = vld [vmem:[#allocation25_spill] sm:$0xff] }
 0x209   : > { %v717_v20 = vpop.permute.xlu0 %716  ;;  %v771_v34 = vadd.f32 %v763_v51, %v730_v0 }
 0x20a   : > { %v724_v50 = vsel %vm676_vm3, %v717_v20, %v2705_v13  ;;  %v723_v6 = vsel %vm676_vm3, %v2700_v22, %v717_v20  ;;  %v849_v20 = vsel %vm848_vm5, %v3183_v8, %v3182_v43 }
 0x20b   : > { %v731_v45 = vadd.f32 %v723_v6, %v686_v11  ;;  %v732_v22 = vadd.f32 %v724_v50, %v687_v28  ;;  %v2176_v50 = vmov 16   ;;  %v3186_v11 = vld [vmem:[#allocation28_spill] sm:$0xff] }
 0x20d   : > { %v721_v62 = vpop.permute.xlu0 %720  ;;  %v772_v38 = vadd.f32 %v764_v21, %v731_v45  ;;  %v2179_v45 = vmov 21  }
 0x20e   : > { %v725_v49 = vsel %vm676_vm3, %v2705_v13, %v721_v62  ;;  %v908_v52 = vpop.permute.xlu1 %907  ;;  %v680_v13 = vsel %vm676_vm3, %v2664_v54, %v2670_v57  ;;  %v773_v57 = vadd.f32 %v765_v15, %v732_v22  ;;  %v2180_v22 = vmov 22  }
 0x20f   : > { %v913_v33 = vrot.slane %v908_v52, %v2474_v24  ;;  %v688_v59 = vadd.f32 %v680_v13, %v647_v14  ;;  %v2177_v52 = vmov 18  }
 0x211   : > { %v799_v23 = vpop.permute.xlu0 %798  ;;  %v915_v2 = vmul.f32 %v913_v33, %v2485_v31  ;;  %v914_v55 = vmul.f32 %v913_v33, %v2476_v25  ;;  %v733_v54 = vadd.f32 %v725_v49, %v688_v59  ;;  %v917_v30 = vmul.f32 %v913_v33, %v2499_v36 }
 0x212   : > { %v808_v48 = vsel %vm762_vm4, %v799_v23, %v2715_v1  ;;  %v916_v35 = vmul.f32 %v913_v33, %v2478_v27  ;;  %v918_v16 = vmul.f32 %v913_v33, %v3180_v37  ;;  %v852_v49 = vsel %vm848_vm5, %v3185_v18, %v3186_v11 }
 0x213   : > { %v816_v3 = vadd.f32 %v808_v48, %v771_v34  ;;  %926 = vrot.lane.b32.xlu1 %v915_v2, %s2174_s7  ;;  %924 = vrot.lane.b32.xlu0 %v914_v55, %s2174_s7  ;;  %v774_v12 = vadd.f32 %v766_v61, %v733_v54  ;;  %v2181_v34 = vmov 24   ;;  %v2182_v23 = vmov 25  }
 0x215   : > { %v803_v29 = vpop.permute.xlu0 %802  ;;  %v857_v46 = vadd.f32 %v849_v20, %v816_v3 }
 0x216   : > { %v809_v56 = vsel %vm762_vm4, %v2715_v1, %v803_v29  ;;  %v810_v39 = vsel %vm762_vm4, %v803_v29, %v2732_v4 }
 0x217   : > { %v817_v40 = vadd.f32 %v809_v56, %v772_v38  ;;  %v818_v47 = vadd.f32 %v810_v39, %v773_v57  ;;  %930 = vrot.lane.b32.xlu1 %v917_v30, %s2174_s7  ;;  %928 = vrot.lane.b32.xlu0 %v916_v35, %s2174_s7 }
 0x219   : > { %v807_v17 = vpop.permute.xlu0 %806 }
 0x21a   : > { %v811_v1 = vsel %vm762_vm4, %v2732_v4, %v807_v17  ;;  %v3184_v4 = vld [vmem:[#allocation27_spill] sm:$0xff] }
 0x21b   : > { %v819_v41 = vadd.f32 %v811_v1, %v774_v12  ;;  %948 = vperm.xlu1 %1924, %v3181_v42   ;;  %932 = vrot.lane.b32.xlu0 %v918_v16, %s2174_s7  ;;  %v850_v26 = vsel %vm848_vm5, %v3182_v43, %v3184_v4  ;;  %v851_v32 = vsel %vm848_vm5, %v3184_v4, %v3185_v18  ;;  %v2184_v43 = vmov 20  }
 0x21c   : > { %v858_v9 = vadd.f32 %v850_v26, %v817_v40  ;;  %v859_v53 = vadd.f32 %v851_v32, %v818_v47 }
 0x21d   : > { %v885_v7 = vpop.permute.xlu0 %884  ;;  %v860_v14 = vadd.f32 %v852_v49, %v819_v41 }
 0x21e   : > { %v894_v58 = vsel %vm848_vm5, %v885_v7, %v2749_v5 }
 0x21f   : > { %v902_v10 = vadd.f32 %v894_v58, %v857_v46  ;;  %1925 = vset.pattern.permute.xlu1 %v2176_v50  ;;  %v2186_v46 = vmov 23   ;;  %v2187_v58 = vmov 26  }
 0x220   : > { %993 = vperm.xlu1 %1925, %v3181_v42  }
 0x221   : > { %v889_v19 = vpop.permute.xlu0 %888 }
 0x222   : > { %v895_v0 = vsel %vm848_vm5, %v2749_v5, %v889_v19  ;;  %v896_v6 = vsel %vm848_vm5, %v889_v19, %v2769_v44  ;;  %v2178_v5 = vmov 19  }
 0x223   : > { %v903_v62 = vadd.f32 %v895_v0, %v858_v9  ;;  %v904_v60 = vadd.f32 %v896_v6, %v859_v53 }
 0x224   : > { %1927 = vset.pattern.permute.xlu1 %v2177_v52 }
 0x225   : > { %v893_v28 = vpop.permute.xlu0 %892  ;;  %1079 = vperm.xlu1 %1927, %v3181_v42  }
 0x226   : > { %v897_v33 = vsel %vm848_vm5, %v2769_v44, %v893_v28  ;;  %v2183_v44 = vmov 27  }
 0x227   : > { %v905_v51 = vadd.f32 %v897_v33, %v860_v14 }
 0x229   : > { %1928 = vset.pattern.permute.xlu1 %v2178_v5 }
 0x22a   : > { %1120 = vperm.xlu1 %1928, %v3181_v42  }
 0x22e   : > { %1930 = vset.pattern.permute.xlu1 %v2179_v45 }
 0x22f   : > { %1206 = vperm.xlu1 %1930, %v3181_v42  }
 0x233   : > { %1931 = vset.pattern.permute.xlu1 %v2180_v22 }
 0x234   : > { %1251 = vperm.xlu1 %1931, %v3181_v42  }
 0x238   : > { %1933 = vset.pattern.permute.xlu1 %v2181_v34 }
 0x239   : > { %1337 = vperm.xlu1 %1933, %v3181_v42  }
 0x23d   : > { %1934 = vset.pattern.permute.xlu1 %v2182_v23 }
 0x23e   : > { %1378 = vperm.xlu1 %1934, %v3181_v42  }
 0x242   : > { %1936 = vset.pattern.permute.xlu1 %v2183_v44 }
 0x243   : > { %1464 = vperm.xlu1 %1936, %v3181_v42  }
 0x285   : > { %v927_v2 = vpop.permute.xlu1 %926  ;;  %v925_v55 = vpop.permute.xlu0 %924 }
 0x286   : > { %v935_v13 = vsel %vm934_vm6, %v925_v55, %v927_v2 }
 0x287   : > { %v943_v48 = vadd.f32 %v935_v13, %v902_v10 }
 0x289   : > { %v931_v21 = vpop.permute.xlu1 %930  ;;  %v929_v59 = vpop.permute.xlu0 %928 }
 0x28a   : > { %v936_v3 = vsel %vm934_vm6, %v927_v2, %v929_v59  ;;  %v937_v15 = vsel %vm934_vm6, %v929_v59, %v931_v21 }
 0x28b   : > { %v2856_v38 = vadd.f32 %v936_v3, %v903_v62  ;;  %v2858_v54 = vadd.f32 %v937_v15, %v904_v60 }
 0x28d   : > { %v933_v57 = vpop.permute.xlu0 %932 }
 0x28e   : > { %v938_v29 = vsel %vm934_vm6, %v931_v21, %v933_v57 }
 0x28f   : > { %v2861_v30 = vadd.f32 %v938_v29, %v905_v51 }
 0x296   : > { %v949_v35 = vpop.permute.xlu1 %948 }
 0x297   : > { %v954_v56 = vrot.slane %v949_v35, %v2474_v24 }
 0x299   : > { %v956_v39 = vmul.f32 %v954_v56, %v2485_v31  ;;  %v955_v40 = vmul.f32 %v954_v56, %v2476_v25  ;;  %v958_v12 = vmul.f32 %v954_v56, %v2499_v36  ;;  %v957_v7 = vmul.f32 %v954_v56, %v2478_v27 }
 0x29a   : > { %v959_v10 = vmul.f32 %v954_v56, %v3180_v37 }
 0x29b   : > { %v966_v47 = vrot.slane %v956_v39, 1  ;;  %v965_v61 = vrot.slane %v955_v40, 1  ;;  %v994_v17 = vpop.permute.xlu1 %993  ;;  %v968_v1 = vrot.slane %v958_v12, 1  ;;  %v967_v63 = vrot.slane %v957_v7, 1 }
 0x29c   : > { %v999_v16 = vrot.slane %v994_v17, %v2474_v24  ;;  %v969_v50 = vrot.slane %v959_v10, 1 }
 0x29d   : > { %972 = vrot.lane.b32.xlu1 %v966_v47, %s2174_s7  ;;  %970 = vrot.lane.b32.xlu0 %v965_v61, %s2174_s7 }
 0x29e   : > { %v1000_v41 = vmul.f32 %v999_v16, %v2476_v25  ;;  %v1002_v8 = vmul.f32 %v999_v16, %v2478_v27  ;;  %v1004_v20 = vmul.f32 %v999_v16, %v3180_v37  ;;  %v1001_v4 = vmul.f32 %v999_v16, %v2485_v31 }
 0x29f   : > { %v1003_v26 = vmul.f32 %v999_v16, %v2499_v36 }
 0x2a0   : > { %v1080_v18 = vpop.permute.xlu1 %1079 }
 0x2a1   : > { %976 = vrot.lane.b32.xlu1 %v968_v1, %s2174_s7  ;;  %1034 = vperm.xlu0 %1926, %v3181_v42   ;;  %v1085_v34 = vrot.slane %v1080_v18, %v2474_v24 }
 0x2a3   : > { %v1086_v13 = vmul.f32 %v1085_v34, %v2476_v25  ;;  %v1088_v15 = vmul.f32 %v1085_v34, %v2478_v27  ;;  %v1087_v57 = vmul.f32 %v1085_v34, %v2485_v31  ;;  %v1090_v17 = vmul.f32 %v1085_v34, %v3180_v37 }
 0x2a4   : > { %v1089_v16 = vmul.f32 %v1085_v34, %v2499_v36 }
 0x2a5   : > { %1929 = vset.pattern.permute.xlu0 %v2184_v43  ;;  %1010 = vrot.lane.b32.xlu1 %v1000_v41, %s2185_s15  ;;  %v1121_v32 = vpop.permute.xlu1 %1120 }
 0x2a6   : > { %1165 = vperm.xlu0 %1929, %v3181_v42   ;;  %v1126_v21 = vrot.slane %v1121_v32, %v2474_v24 }
 0x2a8   : > { %v1128_v56 = vmul.f32 %v1126_v21, %v2485_v31  ;;  %v1127_v39 = vmul.f32 %v1126_v21, %v2476_v25 }
 0x2a9   : > { %1014 = vrot.lane.b32.xlu1 %v1002_v8, %s2185_s15 }
 0x2aa   : > { %1932 = vset.pattern.permute.xlu0 %v2186_v46  ;;  %v1138_v41 = vrot.slane %v1128_v56, 1  ;;  %v1137_v43 = vrot.slane %v1127_v39, 1 }
 0x2ab   : > { %1292 = vperm.xlu0 %1932, %v3181_v42  }
 0x2ad   : > { %1018 = vrot.lane.b32.xlu1 %v1004_v20, %s2185_s15 }
 0x2af   : > { %1935 = vset.pattern.permute.xlu0 %v2187_v58 }
 0x2b0   : > { %1423 = vperm.xlu0 %1935, %v3181_v42   ;;  %v2889_v42 = vpop.permute.xlu1 %1206 }
 0x2b4   : > { %974 = vrot.lane.b32.xlu0 %v967_v63, %s2174_s7  ;;  %v2891_v9 = vpop.permute.xlu1 %1251 }
 0x2b5   : > { %1937 = vset.pattern.permute.xlu0 %v2183_v44 }
 0x2b8   : > { %978 = vrot.lane.b32.xlu0 %v969_v50, %s2174_s7  ;;  %v2893_v53 = vpop.permute.xlu1 %1337 }
 0x2bc   : > { %1012 = vrot.lane.b32.xlu0 %v1001_v4, %s2185_s15  ;;  %v2895_v19 = vpop.permute.xlu1 %1378 }
 0x2c0   : > { %1016 = vrot.lane.b32.xlu0 %v1003_v26, %s2185_s15  ;;  %v2897_v0 = vpop.permute.xlu1 %1464 }
 0x30f   : > { %v973_v6 = vpop.permute.xlu1 %972  ;;  %v971_v62 = vpop.permute.xlu0 %970 }
 0x310   : > { %v980_v60 = vsel %vm934_vm6, %v971_v62, %v973_v6 }
 0x311   : > { %v988_v11 = vadd.f32 %v980_v60, %v943_v48 }
 0x313   : > { %v977_v59 = vpop.permute.xlu1 %976 }
 0x317   : > { %v1011_v35 = vpop.permute.xlu1 %1010 }
 0x31c   : > { %v1035_v49 = vpop.permute.xlu0 %1034 }
 0x31d   : > { %v1040_v52 = vrot.slane %v1035_v49, %v2474_v24 }
 0x31f   : > { %v1042_v14 = vmul.f32 %v1040_v52, %v2485_v31  ;;  %v1041_v28 = vmul.f32 %v1040_v52, %v2476_v25  ;;  %v1044_v45 = vmul.f32 %v1040_v52, %v2499_v36  ;;  %v1043_v22 = vmul.f32 %v1040_v52, %v2478_v27 }
 0x320   : > { %v1045_v2 = vmul.f32 %v1040_v52, %v3180_v37  ;;  %v1129_v37 = vmul.f32 %v1126_v21, %v2478_v27 }
 0x321   : > { %v1052_v33 = vrot.slane %v1042_v14, 1  ;;  %v1051_v51 = vrot.slane %v1041_v28, 1  ;;  %v1166_v5 = vpop.permute.xlu0 %1165  ;;  %v1054_v23 = vrot.slane %v1044_v45, 1  ;;  %v1053_v44 = vrot.slane %v1043_v22, 1 }
 0x322   : > { %v1055_v48 = vrot.slane %v1045_v2, 1  ;;  %v1171_v46 = vrot.slane %v1166_v5, %v2474_v24  ;;  %v1139_v18 = vrot.slane %v1129_v37, 1 }
 0x323   : > { %1058 = vrot.lane.b32.xlu1 %v1052_v33, %s2185_s15  ;;  %1056 = vrot.lane.b32.xlu0 %v1051_v51, %s2185_s15 }
 0x324   : > { %v1173_v52 = vmul.f32 %v1171_v46, %v2485_v31  ;;  %v1174_v14 = vmul.f32 %v1171_v46, %v2478_v27  ;;  %v1175_v51 = vmul.f32 %v1171_v46, %v2499_v36 }
 0x326   : > { %v2909_v55 = vpop.permute.xlu0 %1292 }
 0x327   : > { %1062 = vrot.lane.b32.xlu1 %v1054_v23, %s2185_s15  ;;  %1060 = vrot.lane.b32.xlu0 %v1053_v44, %s2185_s15  ;;  %v1257_v23 = vrot.slane %v2891_v9, %v2474_v24 }
 0x329   : > { %v1260_v9 = vmul.f32 %v1257_v23, %v2478_v27 }
 0x32b   : > { %1096 = vrot.lane.b32.xlu1 %v1086_v13, %s2188_s18  ;;  %1064 = vrot.lane.b32.xlu0 %v1055_v48, %s2185_s15  ;;  %v2917_v3 = vpop.permute.xlu0 %1423  ;;  %v1258_v48 = vmul.f32 %v1257_v23, %v2476_v25 }
 0x32f   : > { %1100 = vrot.lane.b32.xlu1 %v1088_v15, %s2188_s18  ;;  %1098 = vrot.lane.b32.xlu0 %v1087_v57, %s2188_s18  ;;  %v975_v29 = vpop.permute.xlu0 %974  ;;  %v1259_v15 = vmul.f32 %v1257_v23, %v2485_v31 }
 0x330   : > { %v981_v40 = vsel %vm934_vm6, %v973_v6, %v975_v29  ;;  %v982_v47 = vsel %vm934_vm6, %v975_v29, %v977_v59  ;;  %v1172_v6 = vmul.f32 %v1171_v46, %v2476_v25 }
 0x331   : > { %v989_v61 = vadd.f32 %v981_v40, %v2856_v38  ;;  %v990_v12 = vadd.f32 %v982_v47, %v2858_v54  ;;  %v1015_v38 = vpop.permute.xlu1 %1014  ;;  %v1130_v54 = vmul.f32 %v1126_v21, %v2499_v36 }
 0x333   : > { %1104 = vrot.lane.b32.xlu1 %v1090_v17, %s2188_s18  ;;  %1102 = vrot.lane.b32.xlu0 %v1089_v16, %s2188_s18  ;;  %v979_v1 = vpop.permute.xlu0 %978  ;;  %v1140_v26 = vrot.slane %v1130_v54, 1 }
 0x334   : > { %v983_v8 = vsel %vm934_vm6, %v977_v59, %v979_v1  ;;  %v1298_v59 = vrot.slane %v2909_v55, %v2474_v24 }
 0x335   : > { %v2935_v20 = vadd.f32 %v983_v8, %v2861_v30  ;;  %v2946_v30 = vld [vmem:[%s267_s30] sm:$0x3] }
 0x336   : > { %v1131_v10 = vmul.f32 %v2946_v30, %v1126_v21  ;;  %v1176_v5 = vmul.f32 %v2946_v30, %v1171_v46  ;;  %v1300_v57 = vmul.f32 %v1298_v59, %v2485_v31  ;;  %v1299_v29 = vmul.f32 %v1298_v59, %v2476_v25 }
 0x337   : > { %1144 = vrot.lane.b32.xlu1 %v1138_v41, %s2188_s18  ;;  %1142 = vrot.lane.b32.xlu0 %v1137_v43, %s2188_s18  ;;  %v1013_v7 = vpop.permute.xlu0 %1012  ;;  %v1262_v56 = vmul.f32 %v2946_v30, %v1257_v23  ;;  %v1302_v40 = vmul.f32 %v1298_v59, %v2499_v36  ;;  %v1301_v47 = vmul.f32 %v1298_v59, %v2478_v27 }
 0x338   : > { %v1021_v58 = vsel %vm1020_vm7, %v1011_v35, %v1013_v7  ;;  %v1022_v63 = vsel %vm1020_vm7, %v1013_v7, %v1015_v38  ;;  %v1141_v49 = vrot.slane %v1131_v10, 1  ;;  %v1261_v35 = vmul.f32 %v1257_v23, %v2499_v36  ;;  %v1019_v23 = vpop.permute.xlu1 %1018 }
 0x339   : > { %v2949_v50 = vadd.f32 %v1021_v58, %v988_v11  ;;  %v2951_v4 = vadd.f32 %v1022_v63, %v989_v61  ;;  %v1212_v11 = vrot.slane %v2889_v42, %v2474_v24  ;;  %v1310_v55 = vrot.slane %v1300_v57, 1 }
 0x33a   : > { %v1309_v39 = vrot.slane %v1299_v29, 1  ;;  %v1343_v61 = vrot.slane %v2893_v53, %v2474_v24  ;;  %v1311_v17 = vrot.slane %v1301_v47, 1  ;;  %v1303_v16 = vmul.f32 %v2946_v30, %v1298_v59 }
 0x33b   : > { %1148 = vrot.lane.b32.xlu1 %v1140_v26, %s2188_s18  ;;  %1146 = vrot.lane.b32.xlu0 %v1139_v18, %s2188_s18  ;;  %v2955_v32 = vpop.permute.xlu0 %1016  ;;  %v1213_v28 = vmul.f32 %v1212_v11, %v2476_v25  ;;  %v1214_v33 = vmul.f32 %v1212_v11, %v2485_v31  ;;  %v1215_v22 = vmul.f32 %v1212_v11, %v2478_v27 }
 0x33c   : > { %v1023_v62 = vsel %vm1020_vm7, %v1015_v38, %v2955_v32  ;;  %v1216_v34 = vmul.f32 %v1212_v11, %v2499_v36  ;;  %v1217_v13 = vmul.f32 %v2946_v30, %v1212_v11  ;;  %v1344_v1 = vmul.f32 %v1343_v61, %v2476_v25 }
 0x33d   : > { %v2960_v60 = vadd.f32 %v1023_v62, %v990_v12  ;;  %v1223_v42 = vrot.slane %v1213_v28, 1  ;;  %v1224_v45 = vrot.slane %v1214_v33, 1  ;;  %v1225_v44 = vrot.slane %v1215_v22, 1 }
 0x33e   : > { %v1226_v2 = vrot.slane %v1216_v34, 1  ;;  %v1227_v21 = vrot.slane %v1217_v13, 1  ;;  %v1312_v12 = vrot.slane %v1302_v40, 1  ;;  %v1313_v41 = vrot.slane %v1303_v16, 1 }
 0x33f   : > { %1150 = vrot.lane.b32.xlu0 %v1141_v49, %s2188_s18  ;;  %1182 = vrot.lane.b32.xlu1 %v1172_v6, %s2189_s23  ;;  %v1384_v43 = vrot.slane %v2895_v19, %v2474_v24  ;;  %v1346_v8 = vmul.f32 %v1343_v61, %v2478_v27  ;;  %v1345_v53 = vmul.f32 %v1343_v61, %v2485_v31 }
 0x340   : > { %v1348_v37 = vmul.f32 %v2946_v30, %v1343_v61  ;;  %v1347_v46 = vmul.f32 %v1343_v61, %v2499_v36  ;;  %v1429_v10 = vrot.slane %v2917_v3, %v2474_v24  ;;  %v1470_v11 = vrot.slane %v2897_v0, %v2474_v24 }
 0x341   : > { %v1386_v38 = vmul.f32 %v1384_v43, %v2485_v31  ;;  %v1385_v54 = vmul.f32 %v1384_v43, %v2476_v25  ;;  %v1388_v58 = vmul.f32 %v1384_v43, %v2499_v36  ;;  %v1387_v63 = vmul.f32 %v1384_v43, %v2478_v27 }
 0x342   : > { %v1389_v6 = vmul.f32 %v2946_v30, %v1384_v43  ;;  %v1430_v62 = vmul.f32 %v1429_v10, %v2476_v25  ;;  %v1432_v3 = vmul.f32 %v1429_v10, %v2478_v27  ;;  %v1472_v28 = vmul.f32 %v1470_v11, %v2485_v31 }
 0x343   : > { %1184 = vrot.lane.b32.xlu0 %v1173_v52, %s2189_s23  ;;  %1186 = vrot.lane.b32.xlu1 %v1174_v14, %s2189_s23  ;;  %v1396_v19 = vrot.slane %v1386_v38, 1  ;;  %v1395_v7 = vrot.slane %v1385_v54, 1  ;;  %v1398_v26 = vrot.slane %v1388_v58, 1  ;;  %v1397_v18 = vrot.slane %v1387_v63, 1 }
 0x344   : > { %v1399_v49 = vrot.slane %v1389_v6, 1  ;;  %v1431_v52 = vmul.f32 %v1429_v10, %v2485_v31  ;;  %v1471_v14 = vmul.f32 %v1470_v11, %v2476_v25  ;;  %v1433_v33 = vmul.f32 %v1429_v10, %v2499_v36 }
 0x345   : > { %v1475_v25 = vmul.f32 %v2946_v30, %v1470_v11 }
 0x346   : > { %v1481_v0 = vrot.slane %v1471_v14, 1 }
 0x347   : > { %1188 = vrot.lane.b32.xlu0 %v1175_v51, %s2189_s23  ;;  %1190 = vrot.lane.b32.xlu1 %v1176_v5, %s2189_s23  ;;  %v1434_v51 = vmul.f32 %v2946_v30, %v1429_v10  ;;  %v1482_v5 = vrot.slane %v1472_v28, 1  ;;  %v1485_v31 = vrot.slane %v1475_v25, 1 }
 0x34b   : > { %1228 = vrot.lane.b32.xlu0 %v1223_v42, %s2189_s23  ;;  %1230 = vrot.lane.b32.xlu1 %v1224_v45, %s2189_s23  ;;  %v1473_v42 = vmul.f32 %v1470_v11, %v2478_v27  ;;  %v1474_v45 = vmul.f32 %v1470_v11, %v2499_v36  ;;  %v1024_v36 = vsel %vm1020_vm7, %v2955_v32, %v1019_v23 }
 0x34c   : > { %v1032_v57 = vadd.f32 %v1024_v36, %v2935_v20 }
 0x34d   : > { %v1483_v22 = vrot.slane %v1473_v42, 1  ;;  %v1484_v34 = vrot.slane %v1474_v45, 1 }
 0x34f   : > { %1232 = vrot.lane.b32.xlu0 %v1225_v44, %s2189_s23  ;;  %1234 = vrot.lane.b32.xlu1 %v1226_v2, %s2189_s23 }
 0x353   : > { %1236 = vrot.lane.b32.xlu0 %v1227_v21, %s2189_s23  ;;  %1268 = vrot.lane.b32.xlu1 %v1258_v48, %s2190_s0 }
 0x357   : > { %1270 = vrot.lane.b32.xlu0 %v1259_v15, %s2190_s0  ;;  %1272 = vrot.lane.b32.xlu1 %v1260_v9, %s2190_s0 }
 0x35b   : > { %1274 = vrot.lane.b32.xlu0 %v1261_v35, %s2190_s0  ;;  %1276 = vrot.lane.b32.xlu1 %v1262_v56, %s2190_s0 }
 0x35f   : > { %1316 = vrot.lane.b32.xlu1 %v1310_v55, %s2190_s0  ;;  %1314 = vrot.lane.b32.xlu0 %v1309_v39, %s2190_s0 }
 0x363   : > { %1320 = vrot.lane.b32.xlu1 %v1312_v12, %s2190_s0  ;;  %1318 = vrot.lane.b32.xlu0 %v1311_v17, %s2190_s0 }
 0x367   : > { %1354 = vrot.lane.b32.xlu1 %v1344_v1, %s2191_s28  ;;  %1322 = vrot.lane.b32.xlu0 %v1313_v41, %s2190_s0 }
 0x36b   : > { %1358 = vrot.lane.b32.xlu1 %v1346_v8, %s2191_s28  ;;  %1356 = vrot.lane.b32.xlu0 %v1345_v53, %s2191_s28 }
 0x36f   : > { %1362 = vrot.lane.b32.xlu1 %v1348_v37, %s2191_s28  ;;  %1360 = vrot.lane.b32.xlu0 %v1347_v46, %s2191_s28 }
 0x373   : > { %1402 = vrot.lane.b32.xlu1 %v1396_v19, %s2191_s28  ;;  %1400 = vrot.lane.b32.xlu0 %v1395_v7, %s2191_s28 }
 0x377   : > { %1406 = vrot.lane.b32.xlu1 %v1398_v26, %s2191_s28  ;;  %1404 = vrot.lane.b32.xlu0 %v1397_v18, %s2191_s28 }
 0x37b   : > { %1408 = vrot.lane.b32.xlu0 %v1399_v49, %s2191_s28  ;;  %1440 = vrot.lane.b32.xlu1 %v1430_v62, %s2192_s11 }
 0x37f   : > { %1442 = vrot.lane.b32.xlu0 %v1431_v52, %s2192_s11  ;;  %1444 = vrot.lane.b32.xlu1 %v1432_v3, %s2192_s11 }
 0x383   : > { %1446 = vrot.lane.b32.xlu0 %v1433_v33, %s2192_s11  ;;  %1448 = vrot.lane.b32.xlu1 %v1434_v51, %s2192_s11 }
 0x387   : > { %1486 = vrot.lane.b32.xlu0 %v1481_v0, %s2192_s11  ;;  %1488 = vrot.lane.b32.xlu1 %v1482_v5, %s2192_s11 }
 0x38b   : > { %1490 = vrot.lane.b32.xlu0 %v1483_v22, %s2192_s11  ;;  %1492 = vrot.lane.b32.xlu1 %v1484_v34, %s2192_s11 }
 0x38f   : > { %1494 = vrot.lane.b32.xlu0 %v1485_v31, %s2192_s11 }
 0x395   : > { %v1059_v44 = vpop.permute.xlu1 %1058  ;;  %v1057_v2 = vpop.permute.xlu0 %1056 }
 0x396   : > { %v1066_v13 = vsel %vm1020_vm7, %v1057_v2, %v1059_v44 }
 0x397   : > { %v1074_v48 = vadd.f32 %v1066_v13, %v2949_v50 }
 0x399   : > { %v1063_v27 = vpop.permute.xlu1 %1062  ;;  %v1061_v21 = vpop.permute.xlu0 %1060 }
 0x39a   : > { %v1067_v59 = vsel %vm1020_vm7, %v1059_v44, %v1061_v21  ;;  %v1068_v30 = vsel %vm1020_vm7, %v1061_v21, %v1063_v27 }
 0x39b   : > { %v1075_v15 = vadd.f32 %v1067_v59, %v2951_v4  ;;  %v1076_v9 = vadd.f32 %v1068_v30, %v2960_v60 }
 0x39d   : > { %v1097_v29 = vpop.permute.xlu1 %1096  ;;  %v1065_v35 = vpop.permute.xlu0 %1064 }
 0x39e   : > { %v1069_v56 = vsel %vm1020_vm7, %v1063_v27, %v1065_v35 }
 0x39f   : > { %v1077_v50 = vadd.f32 %v1069_v56, %v1032_v57 }
 0x3a1   : > { %v1101_v55 = vpop.permute.xlu1 %1100  ;;  %v1099_v39 = vpop.permute.xlu0 %1098 }
 0x3a2   : > { %v1107_v32 = vsel %vm1106_vm8, %v1097_v29, %v1099_v39  ;;  %v1108_v40 = vsel %vm1106_vm8, %v1099_v39, %v1101_v55 }
 0x3a3   : > { %v1115_v47 = vadd.f32 %v1107_v32, %v1074_v48  ;;  %v1116_v61 = vadd.f32 %v1108_v40, %v1075_v15 }
 0x3a5   : > { %v1105_v12 = vpop.permute.xlu1 %1104  ;;  %v1103_v4 = vpop.permute.xlu0 %1102 }
 0x3a6   : > { %v1109_v60 = vsel %vm1106_vm8, %v1101_v55, %v1103_v4  ;;  %v1110_v20 = vsel %vm1106_vm8, %v1103_v4, %v1105_v12 }
 0x3a7   : > { %v1117_v17 = vadd.f32 %v1109_v60, %v1076_v9  ;;  %v1118_v16 = vadd.f32 %v1110_v20, %v1077_v50 }
 0x3a9   : > { %v1145_v1 = vpop.permute.xlu1 %1144  ;;  %v1143_v41 = vpop.permute.xlu0 %1142 }
 0x3aa   : > { %v1152_v43 = vsel %vm1106_vm8, %v1143_v41, %v1145_v1 }
 0x3ab   : > { %v1160_v8 = vadd.f32 %v1152_v43, %v1115_v47 }
 0x3ad   : > { %v1149_v53 = vpop.permute.xlu1 %1148  ;;  %v1147_v38 = vpop.permute.xlu0 %1146 }
 0x3ae   : > { %v1153_v54 = vsel %vm1106_vm8, %v1145_v1, %v1147_v38  ;;  %v1154_v37 = vsel %vm1106_vm8, %v1147_v38, %v1149_v53 }
 0x3af   : > { %v1161_v46 = vadd.f32 %v1153_v54, %v1116_v61  ;;  %v1162_v19 = vadd.f32 %v1154_v37, %v1117_v17 }
 0x3b1   : > { %v1183_v7 = vpop.permute.xlu1 %1182  ;;  %v1151_v58 = vpop.permute.xlu0 %1150 }
 0x3b2   : > { %v1155_v63 = vsel %vm1106_vm8, %v1149_v53, %v1151_v58 }
 0x3b3   : > { %v1163_v10 = vadd.f32 %v1155_v63, %v1118_v16 }
 0x3b5   : > { %v1187_v26 = vpop.permute.xlu1 %1186  ;;  %v1185_v18 = vpop.permute.xlu0 %1184 }
 0x3b6   : > { %v1193_v59 = vsel %vm1192_vm9, %v1183_v7, %v1185_v18  ;;  %v1194_v29 = vsel %vm1192_vm9, %v1185_v18, %v1187_v26 }
 0x3b7   : > { %v1201_v15 = vadd.f32 %v1193_v59, %v1160_v8  ;;  %v1202_v40 = vadd.f32 %v1194_v29, %v1161_v46 }
 0x3b9   : > { %v1191_v6 = vpop.permute.xlu1 %1190  ;;  %v1189_v62 = vpop.permute.xlu0 %1188 }
 0x3ba   : > { %v1195_v35 = vsel %vm1192_vm9, %v1187_v26, %v1189_v62  ;;  %v1196_v60 = vsel %vm1192_vm9, %v1189_v62, %v1191_v6 }
 0x3bb   : > { %v1203_v47 = vadd.f32 %v1195_v35, %v1162_v19  ;;  %v1204_v37 = vadd.f32 %v1196_v60, %v1163_v10 }
 0x3bd   : > { %v1231_v49 = vpop.permute.xlu1 %1230  ;;  %v1229_v11 = vpop.permute.xlu0 %1228 }
 0x3be   : > { %v1238_v30 = vsel %vm1192_vm9, %v1229_v11, %v1231_v49 }
 0x3bf   : > { %v1246_v50 = vadd.f32 %v1238_v30, %v1201_v15 }
 0x3c1   : > { %v1235_v52 = vpop.permute.xlu1 %1234  ;;  %v1233_v3 = vpop.permute.xlu0 %1232 }
 0x3c2   : > { %v1239_v55 = vsel %vm1192_vm9, %v1231_v49, %v1233_v3  ;;  %v1240_v39 = vsel %vm1192_vm9, %v1233_v3, %v1235_v52 }
 0x3c3   : > { %v1247_v1 = vadd.f32 %v1239_v55, %v1202_v40  ;;  %v1248_v41 = vadd.f32 %v1240_v39, %v1203_v47 }
 0x3c5   : > { %v1269_v14 = vpop.permute.xlu1 %1268  ;;  %v1237_v28 = vpop.permute.xlu0 %1236 }
 0x3c6   : > { %v1241_v8 = vsel %vm1192_vm9, %v1235_v52, %v1237_v28 }
 0x3c7   : > { %v1249_v49 = vadd.f32 %v1241_v8, %v1204_v37  ;;  %v1536_v37 = vld [vmem:[%s2446_s1] sm:$0xf]  ;;  %s1609_s1 = scalar_lea.hbm %s3127_s4, %s1776_s26 }
 0x3c9   : > { %v1273_v33 = vpop.permute.xlu1 %1272  ;;  %v1271_v51 = vpop.permute.xlu0 %1270 }
 0x3ca   : > { %v1279_v56 = vsel %vm1278_vm10, %v1269_v14, %v1271_v51  ;;  %v1280_v20 = vsel %vm1278_vm10, %v1271_v51, %v1273_v33 }
 0x3cb   : > { %v1287_v61 = vadd.f32 %v1279_v56, %v1246_v50  ;;  %v1288_v46 = vadd.f32 %v1280_v20, %v1247_v1 }
 0x3cd   : > { %v1277_v0 = vpop.permute.xlu1 %1276  ;;  %v1275_v5 = vpop.permute.xlu0 %1274 }
 0x3ce   : > { %v1281_v17 = vsel %vm1278_vm10, %v1273_v33, %v1275_v5  ;;  %v1282_v26 = vsel %vm1278_vm10, %v1275_v5, %v1277_v0 }
 0x3cf   : > { %v1289_v19 = vadd.f32 %v1281_v17, %v1248_v41  ;;  %v1290_v33 = vadd.f32 %v1282_v26, %v1249_v49 }
 0x3d1   : > { %v1317_v42 = vpop.permute.xlu1 %1316  ;;  %v1315_v45 = vpop.permute.xlu0 %1314 }
 0x3d2   : > { %v1324_v32 = vsel %vm1278_vm10, %v1315_v45, %v1317_v42 }
 0x3d3   : > { %v1332_v43 = vadd.f32 %v1324_v32, %v1287_v61 }
 0x3d5   : > { %v1321_v22 = vpop.permute.xlu1 %1320  ;;  %v1319_v34 = vpop.permute.xlu0 %1318 }
 0x3d6   : > { %v1325_v53 = vsel %vm1278_vm10, %v1317_v42, %v1319_v34  ;;  %v1326_v38 = vsel %vm1278_vm10, %v1319_v34, %v1321_v22 }
 0x3d7   : > { %v1333_v11 = vadd.f32 %v1325_v53, %v1288_v46  ;;  %v1334_v52 = vadd.f32 %v1326_v38, %v1289_v19  ;;  %v3187_v46 = vld [vmem:[#allocation22_spill] sm:$0xff] }
 0x3d8   : > { %v1544_v19 = vsub.s32 1, %v3187_v46 }
 0x3d9   : > { %v1355_v25 = vpop.permute.xlu1 %1354  ;;  %v1323_v31 = vpop.permute.xlu0 %1322 }
 0x3da   : > { %v1327_v14 = vsel %vm1278_vm10, %v1321_v22, %v1323_v31 }
 0x3db   : > { %v1335_v22 = vadd.f32 %v1327_v14, %v1290_v33 }
 0x3dd   : > { %v1359_v23 = vpop.permute.xlu1 %1358  ;;  %v1357_v44 = vpop.permute.xlu0 %1356 }
 0x3de   : > { %v1365_v16 = vsel %vm1364_vm11, %v1355_v25, %v1357_v44  ;;  %v1366_v18 = vsel %vm1364_vm11, %v1357_v44, %v1359_v23 }
 0x3df   : > { %v1373_v7 = vadd.f32 %v1365_v16, %v1332_v43  ;;  %v1374_v51 = vadd.f32 %v1366_v18, %v1333_v11  ;;  %v1541_v18 = vrot.slane %v1536_v37, %v2474_v24  ;;  %v1545_v11 = vrot.slane %v1536_v37, %v1544_v19 }
 0x3e1   : > { %v1363_v2 = vpop.permute.xlu1 %1362  ;;  %v1361_v13 = vpop.permute.xlu0 %1360 }
 0x3e2   : > { %v1367_v6 = vsel %vm1364_vm11, %v1359_v23, %v1361_v13  ;;  %v1368_v34 = vsel %vm1364_vm11, %v1361_v13, %v1363_v2 }
 0x3e3   : > { %v1375_v0 = vadd.f32 %v1367_v6, %v1334_v52  ;;  %v1376_v59 = vadd.f32 %v1368_v34, %v1335_v22  ;;  %v1548_v52 = vsub.s32 2, %v3187_v46 }
 0x3e5   : > { %v1403_v48 = vpop.permute.xlu1 %1402  ;;  %v1401_v27 = vpop.permute.xlu0 %1400 }
 0x3e6   : > { %v1410_v54 = vsel %vm1364_vm11, %v1401_v27, %v1403_v48 }
 0x3e7   : > { %v1418_v3 = vadd.f32 %v1410_v54, %v1373_v7 }
 0x3e9   : > { %v3034_v21 = vpop.permute.xlu1 %1406  ;;  %v1405_v36 = vpop.permute.xlu0 %1404 }
 0x3ea   : > { %v1411_v10 = vsel %vm1364_vm11, %v1403_v48, %v1405_v36  ;;  %v1412_v28 = vsel %vm1364_vm11, %v1405_v36, %v3034_v21 }
 0x3eb   : > { %v1419_v31 = vadd.f32 %v1411_v10, %v1374_v51  ;;  %v1420_v48 = vadd.f32 %v1412_v28, %v1375_v0  ;;  %v1552_v10 = vsub.s32 3, %v3187_v46 }
 0x3ed   : > { %v1441_v9 = vpop.permute.xlu1 %1440  ;;  %v1409_v57 = vpop.permute.xlu0 %1408  ;;  %v1553_v34 = vrot.slane %v1536_v37, %v1552_v10 }
 0x3ee   : > { %v1413_v36 = vsel %vm1364_vm11, %v3034_v21, %v1409_v57 }
 0x3ef   : > { %v1421_v50 = vadd.f32 %v1413_v36, %v1376_v59 }
 0x3f1   : > { %v1445_v12 = vpop.permute.xlu1 %1444  ;;  %v1443_v4 = vpop.permute.xlu0 %1442 }
 0x3f2   : > { %v1451_v62 = vsel %vm1450_vm12, %v1441_v9, %v1443_v4  ;;  %v1452_v25 = vsel %vm1450_vm12, %v1443_v4, %v1445_v12 }
 0x3f3   : > { %v1459_v5 = vadd.f32 %v1451_v62, %v1418_v3  ;;  %v1460_v30 = vadd.f32 %v1452_v25, %v1419_v31  ;;  %v2193_v3 = vmov 1966171168  }
 0x3f4   : > { %v1569_v14 = vunpack.c.l.s4 %v2193_v3 }
 0x3f5   : > { %v1449_v58 = vpop.permute.xlu1 %1448  ;;  %v1447_v63 = vpop.permute.xlu0 %1446 }
 0x3f6   : > { %v1453_v23 = vsel %vm1450_vm12, %v1445_v12, %v1447_v63  ;;  %v1454_v2 = vsel %vm1450_vm12, %v1447_v63, %v1449_v58  ;;  %v1570_v24 = vunpack.c.0.s8 %v1569_v14 }
 0x3f7   : > { %v1461_v15 = vadd.f32 %v1453_v23, %v1420_v48  ;;  %v1462_v40 = vadd.f32 %v1454_v2, %v1421_v50 }
 0x3f9   : > { %v1489_v42 = vpop.permute.xlu1 %1488  ;;  %v1487_v45 = vpop.permute.xlu0 %1486 }
 0x3fa   : > { %v1496_v44 = vsel %vm1450_vm12, %v1487_v45, %v1489_v42  ;;  %v1549_v45 = vrot.slane %v1536_v37, %v1548_v52 }
 0x3fb   : > { %v1504_v27 = vadd.f32 %v1496_v44, %v1459_v5 }
 0x3fd   : > { %v1508_v9 = vmul.f32 32768.0, %v1504_v27  ;;  %v1493_v29 = vpop.permute.xlu1 %1492  ;;  %v1491_v35 = vpop.permute.xlu0 %1490  ;;  %v1573_v27 = vsub.s32 %v1570_v24, %v3187_v46 }
 0x3fe   : > { %v1497_v13 = vsel %vm1450_vm12, %v1489_v42, %v1491_v35  ;;  %v1498_v56 = vsel %vm1450_vm12, %v1491_v35, %v1493_v29  ;;  %v3188_v35 = vlaneseq }
 0x3ff   : > { %v1779_v55 = vtrunc.f32 %v1508_v9  ;;  %v1505_v39 = vadd.f32 %v1497_v13, %v1460_v30  ;;  %v1506_v32 = vadd.f32 %v1498_v56, %v1461_v15 }
 0x400   : > { %vm1593_vm13 = vcmp.lt.s32.totalorder %v3188_v35, 512 }
 0x401   : > { %v1780_v47 = vcvt.f32.s32 %v1779_v55  ;;  %v1509_v61 = vmul.f32 32768.0, %v1505_v39  ;;  %v1510_v21 = vmul.f32 32768.0, %v1506_v32  ;;  %v1495_v57 = vpop.permute.xlu0 %1494 }
 0x402   : > { %v1499_v12 = vsel %vm1450_vm12, %v1493_v29, %v1495_v57 }
 0x403   : > { %v1516_v4 = vadd.s32 32768, %v1780_v47  ;;  %v1781_v60 = vtrunc.f32 %v1509_v61  ;;  %v1783_v20 = vtrunc.f32 %v1510_v21  ;;  %v1507_v17 = vadd.f32 %v1499_v12, %v1462_v40 }
 0x405   : > { %v1520_v16 = vand.u32 65535, %v1516_v4  ;;  %v1782_v1 = vcvt.f32.s32 %v1781_v60  ;;  %v1784_v41 = vcvt.f32.s32 %v1783_v20  ;;  %v1511_v43 = vmul.f32 32768.0, %v1507_v17 }
 0x407   : > { %v1761_v8 = vadd.s32 4294934528, %v1520_v16  ;;  %v1517_v53 = vadd.s32 32768, %v1782_v1  ;;  %v1518_v38 = vadd.s32 32768, %v1784_v41  ;;  %v1785_v54 = vtrunc.f32 %v1511_v43 }
 0x409   : > { %v1528_v7 = vcvt.s32.f32 %v1761_v8  ;;  %v1521_v58 = vand.u32 65535, %v1517_v53  ;;  %v1522_v63 = vand.u32 65535, %v1518_v38  ;;  %v1786_v26 = vcvt.f32.s32 %v1785_v54 }
 0x40b   : > { %v1762_v6 = vadd.s32 4294934528, %v1521_v58  ;;  %v1763_v62 = vadd.s32 4294934528, %v1522_v63  ;;  %v1519_v49 = vadd.s32 32768, %v1786_v26  ;;  %v1532_v28 = vmul.f32 3.0517578e-05, %v1528_v7 }
 0x40d   : > { %v1529_v33 = vcvt.s32.f32 %v1762_v6  ;;  %v1530_v51 = vcvt.s32.f32 %v1763_v62  ;;  %v1523_v0 = vand.u32 65535, %v1519_v49  ;;  %v1558_v25 = vmul.f32 %v1541_v18, %v1532_v28 }
 0x40f   : > { %v1533_v5 = vmul.f32 3.0517578e-05, %v1529_v33  ;;  %v1764_v42 = vadd.s32 4294934528, %v1523_v0  ;;  %v1534_v23 = vmul.f32 3.0517578e-05, %v1530_v51 }
 0x411   : > { %v1559_v44 = vmul.f32 %v1545_v11, %v1533_v5  ;;  %v1531_v22 = vcvt.s32.f32 %v1764_v42  ;;  %v1560_v36 = vmul.f32 %v1549_v45, %v1534_v23 }
 0x413   : > { %v1566_v31 = vcombine.low %v1558_v25, %v1559_v44  ;;  %v1535_v48 = vmul.f32 3.0517578e-05, %v1531_v22 }
 0x415   : > { %v1561_v59 = vmul.f32 %v1553_v34, %v1535_v48  ;;  %v1574_v15 = vrot.slane %v1566_v31, %v1573_v27 }
 0x417   : > { %v1567_v30 = vcombine.low %v1560_v36, %v1561_v59 }
 0x419   : > { %v1581_v9 = vrot.slane %v1567_v30, %v1573_v27 }
 0x41b   : > { %v1582_v29 = vcombine.low %v1574_v15, %v1581_v9 }
 0x41d   : > { %v1589_v2 = vrot.slane %v1582_v29, %v1573_v27 }
 0x41f   : > { %1595 = vst.msk [vmem:[%s310_s14] sm:$0xf] %vm1593_vm13, %v1589_v2 }
 0x420   : > { %2058 = shalt.err (!%p2055_p4)
}
 0x421   : > { %s2059_s8 = scalar_lea.hbm %s1609_s1, 64  ;;  %s2063_s24 = scalar_lea.hbm %s3127_s4, 128 }
 0x422   : > { %p2060_p5 = scmp.ne.s32.totalorder %s1609_s1, %s2059_s8  ;;  %p2064_p0 = scmp.lt.s32.totalorder %s1609_s1, %s3127_s4 }
 0x423   : > { %p2065_p8 = scmp.lt.s32.totalorder %s2063_s24, %s2059_s8 }
 0x424   : > { %p2061_p1 = pnand %p2060_p5, %p3189_p13 }
 0x425   : > { %p2066_p12 = por %p2065_p8, %p2064_p0 }
 0x426   : > { %p2062_p9 = pneg %p2061_p1 }
 0x428   : > { %p2067_p3 = pnand %p2066_p12, %p2062_p9 }
 0x42a   : > { %2070 = shalt.err (!%p2067_p3)
}
 0x42b   : > { %1796 = dma.vmem_to_hbm [thread:$0]  (%p3189_p13), %s1612_s5, 64, %s1609_s1, %s1597_s29  }
 0x42c PF: > { %s3190_s18 = sld [smem:[#allocation16_spill]]  ;;  %p3193_p7 = scmp.ge.s32.totalorder %s2145_s21, 2 }
 0x42d   : > { %s3191_s23 = sld [smem:[#allocation20_spill]] }
 0x432   : > { %s1623_s0 = sand.u32 1, %s3190_s18  }
 0x433   : > { %p3192_p6 = scmp.ne.s32.totalorder %s3191_s23, 0  ;;  %s1624_s28 = scalar_lea.sflag [#allocation4], %s1623_s0 }
 0x435   : > { %p1803_p11 = pnand %p3193_p7, %p3192_p6 }
 0x437   : > { %p1804_p2 = pneg %p1803_p11 }
 0x439   : > { %2116 = dma.done.wait (%p1804_p2), %s1624_s28, 64  }
 0x43a   : > { %2118 = vsyncadd (%p1804_p2), %s1624_s28, 4294967232  ;;  %s3194_s21 = sld [smem:[#allocation17_spill]]  ;;  %s3197_s15 = smov %s2125_s16 }
 0x43b   : > { %s3195_s11 = sld [smem:[#allocation19_spill]]  ;;  %s3198_s16 = smov %s2129_s17 }
 0x43c   : > { %s3196_s12 = sld [smem:[#allocation18_spill]]  ;;  %s3200_s18 = smov %s2137_s19 }
 0x43d   : > { %s3201_s19 = smov %s2141_s20 }
 0x440   : > { %p21_p13 = scmp.ge.s32.totalorder %s3194_s21, 4  }
 0x441   : > { %s3199_s17 = smov %s3195_s11 }
 0x442   : > { %s3202_s20 = smov %s3196_s12  ;;  %23 = sbr.rel (!%p21_p13) target bundleno = 13 (0xd), region = 110 }
 0x447   :  { %1629 = vsyncpa [#allocation3], 1 }
 0x448   :  { %1631 = vsyncpa [#allocation3 + $0x1], 1 }
 0x449   :  { %1632 = vsyncpa [#allocation6], 1 }
 0x44a   :  { %1634 = vsyncpa [#allocation6 + $0x1], 1 }
 0x44b   :  { %1635 = vsyncpa [#allocation9], 1 }
 0x44c   :  { %1637 = vsyncpa [#allocation9 + $0x1], 1 }
 0x44d   :  { %1638 = vsyncpa [#allocation4], 1 }
 0x44e   :  { %1640 = vsyncpa [#allocation4 + $0x1], 1 }

</bundles_post_ra>
